<compile_context>
chip_gen: v6e
topology: v6e:2x2x1
jax: 0.10.0
libtpu: 0.0.40
codegen_flags: <defaults>
</compile_context>

<pallas_src>
import jax
import jax.numpy as jnp
from jax.experimental import pallas as pl
from jax.experimental.pallas import tpu as pltpu

EPS = 1e-5
LANE = 128
VMEM_LIMIT = 32 * 1024 * 1024     # <= physical / scoped limits on v5e, v6e, v7x


def _round_up(x, m):
    return (x + m - 1) // m * m


def _pick_tile_rows(ho, w, cin_p, cout_p, budget_bytes=4 * 1024 * 1024):
    """Largest divisor of `ho` whose per-tile working set fits the budget."""
    best = 1
    for th in range(1, ho + 1):
        if ho % th:
            continue
        halo = (th + 2) * (w + 2) * cin_p * 4
        im2col = th * w * 9 * cin_p * 4
        outbuf = 2 * th * w * cout_p * 4
        if halo + im2col + outbuf <= budget_bytes:
            best = th
    return best


# ------------------------- 3x3 conv + BN-partial-stats -------------------------

def _make_conv3_kernel(*, stride, th, wo, hi, wi, cin_p, cout_p, n_row_tiles, pre_relu):
    """One (batch, row-tile) grid cell of a 3x3 conv (pad=1, given stride).

    Writes the raw conv output tile plus per-tile BatchNorm partials
    (sum, sum-of-squares).  If `pre_relu`, the input tile is first transformed
    with a per-channel affine + ReLU (the previous layer's BatchNorm), and the
    spatial zero-padding is re-applied afterwards (conv pads the *activated*
    tensor)."""
    full = th * stride + 2        # input rows needed per output row-tile (incl. halo)

    def kernel(*refs):
        if pre_relu:
            x_hbm, w_ref, sc_ref, sh_ref, y_ref, stats_ref, xh_ref = refs
        else:
            x_hbm, w_ref, y_ref, stats_ref, xh_ref = refs

        n = pl.program_id(0)
        t = pl.program_id(1)
        row0 = t * (th * stride) - 1          # first halo row (unpadded input coords)

        # Zero the left/right spatial-padding columns of the halo scratch.
        xh_ref[:, 0:1, :] = jnp.zeros((full, 1, cin_p), jnp.float32)
        xh_ref[:, wi + 1:wi + 2, :] = jnp.zeros((full, 1, cin_p), jnp.float32)

        def copy_rows(src_row, dst_row, nrows):
            pltpu.sync_copy(
                x_hbm.at[n, pl.ds(src_row, nrows), :, :],
                xh_ref.at[pl.ds(dst_row, nrows), pl.ds(1, wi), :])

        if n_row_tiles == 1:
            xh_ref[0:1, :, :] = jnp.zeros((1, wi + 2, cin_p), jnp.float32)
            xh_ref[full - 1:full, :, :] = jnp.zeros((1, wi + 2, cin_p), jnp.float32)
            copy_rows(0, 1, hi)
        else:
            @pl.when(t == 0)
            def _():
                xh_ref[0:1, :, :] = jnp.zeros((1, wi + 2, cin_p), jnp.float32)
                copy_rows(0, 1, full - 1)

            @pl.when(t == n_row_tiles - 1)
            def _():
                xh_ref[full - 1:full, :, :] = jnp.zeros((1, wi + 2, cin_p), jnp.float32)
                copy_rows(row0, 0, full - 1)

            @pl.when(jnp.logical_and(t > 0, t < n_row_tiles - 1))
            def _():
                copy_rows(row0, 0, full)

        xh = xh_ref[...]                                     # (full, wi+2, cin_p)

        if pre_relu:
            scale = sc_ref[...].reshape(1, 1, cin_p)
            shift = sh_ref[...].reshape(1, 1, cin_p)
            xh = jnp.maximum(xh * scale + shift, 0.0)
            # Padding must be zero *after* BN+ReLU -> force halo border back to 0.
            rows = jax.lax.broadcasted_iota(jnp.int32, (full, wi + 2, cin_p), 0)
            cols = jax.lax.broadcasted_iota(jnp.int32, (full, wi + 2, cin_p), 1)
            valid = jnp.logical_and(cols >= 1, cols <= wi)
            valid = jnp.logical_and(valid, jnp.logical_or(t != 0, rows >= 1))
            valid = jnp.logical_and(
                valid, jnp.logical_or(t != n_row_tiles - 1, rows <= full - 2))
            xh = jnp.where(valid, xh, 0.0)

        # im2col: 9 shifted windows -> one (th*wo, 9*cin_p) matrix, single MXU matmul.
        taps = []
        for kh in range(3):
            for kw in range(3):
                taps.append(jax.lax.slice(
                    xh, (kh, kw, 0),
                    (kh + (th - 1) * stride + 1, kw + (wo - 1) * stride + 1, cin_p),
                    (stride, stride, 1)))                    # (th, wo, cin_p)
        patches = jnp.concatenate(taps, axis=-1).reshape(th * wo, 9 * cin_p)
        acc = jnp.dot(patches, w_ref[...], preferred_element_type=jnp.float32)

        # Per-tile BatchNorm partials (sum, sum of squares).
        s1 = jnp.sum(acc, axis=0, keepdims=True)
        s2 = jnp.sum(acc * acc, axis=0, keepdims=True)
        stats_ref[...] = jnp.concatenate([s1, s2], axis=0).reshape(1, 1, 2, cout_p)

        y_ref[...] = acc.reshape(1, th, wo, cout_p)

    return kernel


def _conv3x3_bn_stats(x, w_flat, th, ho, wo, stride, pre_scale=None, pre_shift=None):
    n, hi, wi, cin_p = x.shape
    cout_p = w_flat.shape[-1]
    t = ho // th
    pre = pre_scale is not None
    kernel = _make_conv3_kernel(stride=stride, th=th, wo=wo, hi=hi, wi=wi,
                                cin_p=cin_p, cout_p=cout_p, n_row_tiles=t,
                                pre_relu=pre)
    in_specs = [pl.BlockSpec(memory_space=pl.ANY),   # input stays in HBM; halo DMA'd in-kernel
                pl.BlockSpec((9 * cin_p, cout_p), lambda i, j: (0, 0))]
    args = [x, w_flat]
    if pre:
        in_specs += [pl.BlockSpec((1, cin_p), lambda i, j: (0, 0)),
                     pl.BlockSpec((1, cin_p), lambda i, j: (0, 0))]
        args += [pre_scale, pre_shift]
    return pl.pallas_call(
        kernel,
        out_shape=(jax.ShapeDtypeStruct((n, ho, wo, cout_p), jnp.float32),
                   jax.ShapeDtypeStruct((n, t, 2, cout_p), jnp.float32)),
        grid=(n, t),
        in_specs=in_specs,
        out_specs=(pl.BlockSpec((1, th, wo, cout_p), lambda i, j: (i, j, 0, 0)),
                   pl.BlockSpec((1, 1, 2, cout_p), lambda i, j: (i, j, 0, 0))),
        scratch_shapes=[pltpu.VMEM((th * stride + 2, wi + 2, cin_p), jnp.float32)],
        compiler_params=pltpu.CompilerParams(
            dimension_semantics=("parallel", "parallel"),
            vmem_limit_bytes=VMEM_LIMIT),
    )(*args)


# ------------------------- 1x1 projection conv + stats -------------------------

def _make_conv1x1_kernel(*, stride, th, wo, wi, cin_p, cout_p):
    def kernel(x_ref, w_ref, y_ref, stats_ref):
        x = x_ref[...][0]                                    # (th*stride, wi, cin_p)
        if stride > 1:
            x = jax.lax.slice(x, (0, 0, 0),
                              ((th - 1) * stride + 1, (wo - 1) * stride + 1, cin_p),
                              (stride, stride, 1))
        x = x.reshape(th * wo, cin_p)
        acc = jnp.dot(x, w_ref[...], preferred_element_type=jnp.float32)
        s1 = jnp.sum(acc, axis=0, keepdims=True)
        s2 = jnp.sum(acc * acc, axis=0, keepdims=True)
        stats_ref[...] = jnp.concatenate([s1, s2], axis=0).reshape(1, 1, 2, cout_p)
        y_ref[...] = acc.reshape(1, th, wo, cout_p)
    return kernel


def _conv1x1_bn_stats(x, w_mat, th, ho, wo, stride):
    n, hi, wi, cin_p = x.shape
    cout_p = w_mat.shape[-1]
    t = ho // th
    kernel = _make_conv1x1_kernel(stride=stride, th=th, wo=wo, wi=wi,
                                  cin_p=cin_p, cout_p=cout_p)
    return pl.pallas_call(
        kernel,
        out_shape=(jax.ShapeDtypeStruct((n, ho, wo, cout_p), jnp.float32),
                   jax.ShapeDtypeStruct((n, t, 2, cout_p), jnp.float32)),
        grid=(n, t),
        in_specs=[pl.BlockSpec((1, th * stride, wi, cin_p), lambda i, j: (i, j, 0, 0)),
                  pl.BlockSpec((cin_p, cout_p), lambda i, j: (0, 0))],
        out_specs=(pl.BlockSpec((1, th, wo, cout_p), lambda i, j: (i, j, 0, 0)),
                   pl.BlockSpec((1, 1, 2, cout_p), lambda i, j: (i, j, 0, 0))),
        compiler_params=pltpu.CompilerParams(
            dimension_semantics=("parallel", "parallel"),
            vmem_limit_bytes=VMEM_LIMIT),
    )(x, w_mat)


# ------------------ fused BN2 + shortcut-BN + residual + ReLU ------------------

def _bn_add_relu_kernel(y_ref, r_ref, sy_ref, ty_ref, sr_ref, tr_ref, o_ref):
    cp = y_ref.shape[-1]
    sy = sy_ref[...].reshape(1, 1, 1, cp)
    ty = ty_ref[...].reshape(1, 1, 1, cp)
    sr = sr_ref[...].reshape(1, 1, 1, cp)
    tr = tr_ref[...].reshape(1, 1, 1, cp)
    o_ref[...] = jnp.maximum(y_ref[...] * sy + ty + (r_ref[...] * sr + tr), 0.0)


def _bn_add_relu(y, res, sy, ty, sr, tr, th):
    n, ho, wo, cp = y.shape
    t = ho // th
    tile = pl.BlockSpec((1, th, wo, cp), lambda i, j: (i, j, 0, 0))
    vec = pl.BlockSpec((1, cp), lambda i, j: (0, 0))
    return pl.pallas_call(
        _bn_add_relu_kernel,
        out_shape=jax.ShapeDtypeStruct((n, ho, wo, cp), jnp.float32),
        grid=(n, t),
        in_specs=[tile, tile, vec, vec, vec, vec],
        out_specs=tile,
        compiler_params=pltpu.CompilerParams(
            dimension_semantics=("parallel", "parallel"),
            vmem_limit_bytes=VMEM_LIMIT),
    )(y, res, sy, ty, sr, tr)


# ---------------------------- BN partials -> affine ----------------------------

def _bn_scale_shift(stats, gamma_p, beta_p, count):
    """Per-tile (sum, sum_sq) partials -> per-channel BatchNorm scale/shift (f32)."""
    s1 = jnp.sum(stats[:, :, 0, :], axis=(0, 1))
    s2 = jnp.sum(stats[:, :, 1, :], axis=(0, 1))
    mean = s1 / count
    var = jnp.maximum(s2 / count - mean * mean, 0.0)       # biased variance
    scale = gamma_p * jax.lax.rsqrt(var + EPS)
    shift = beta_p - mean * scale
    return scale.reshape(1, -1), shift.reshape(1, -1)


# ---------------------------------- forward ----------------------------------

def residual_block_forward(x_nchw, params, *, stride=1, tile_rows=None):
    """Forward pass of ResidualBlock.  Input/output NCHW (PyTorch layout).

    BatchNorm uses training-mode batch statistics (nn.BatchNorm2d default
    forward); running-stat buffers are not updated.  Conv biases are accepted
    but unused: they cancel exactly under batch-statistics BatchNorm.
    """
    x = jnp.transpose(x_nchw, (0, 2, 3, 1)).astype(jnp.float32)     # NHWC
    n, hi, wi, cin = x.shape
    cout = params["w1"].shape[-1]
    ho = (hi - 1) // stride + 1
    wo = (wi - 1) // stride + 1
    cin_p = _round_up(cin, LANE)
    cout_p = _round_up(cout, LANE)

    if tile_rows is None:
        tile_rows = _pick_tile_rows(ho, max(wi, wo), max(cin_p, cout_p), cout_p)
    th = tile_rows
    assert ho % th == 0, "tile_rows must divide the output height"

    # Channel-pad activations / parameters to the 128-lane width.
    xp = jnp.pad(x, ((0, 0), (0, 0), (0, 0), (0, cin_p - cin)))
    pad_o = (0, cout_p - cout)
    w1 = jnp.pad(params["w1"].astype(jnp.float32),
                 ((0, 0), (0, 0), (0, cin_p - cin), pad_o)).reshape(9 * cin_p, cout_p)
    w2 = jnp.pad(params["w2"].astype(jnp.float32),
                 ((0, 0), (0, 0), pad_o, pad_o)).reshape(9 * cout_p, cout_p)
    g1 = jnp.pad(params["g1"].astype(jnp.float32), pad_o)
    b1 = jnp.pad(params["be1"].astype(jnp.float32), pad_o)
    g2 = jnp.pad(params["g2"].astype(jnp.float32), pad_o)
    b2 = jnp.pad(params["be2"].astype(jnp.float32), pad_o)

    count = n * ho * wo

    # conv1 (3x3, stride) -> raw output + BN1 partial stats.
    y1, st1 = _conv3x3_bn_stats(xp, w1, th, ho, wo, stride)
    sc1, sh1 = _bn_scale_shift(st1, g1, b1, count)

    # conv2 (3x3, stride 1) with BN1+ReLU fused onto its input tiles.
    y2, st2 = _conv3x3_bn_stats(y1, w2, th, ho, wo, 1, pre_scale=sc1, pre_shift=sh1)
    sc2, sh2 = _bn_scale_shift(st2, g2, b2, count)

    # Shortcut: identity, or 1x1 conv (stride) + BN.
    if stride != 1 or cin != cout:
        wsc = jnp.pad(params["wsc"].astype(jnp.float32),
                      ((0, 0), (0, 0), (0, cin_p - cin), pad_o)).reshape(cin_p, cout_p)
        gsc = jnp.pad(params["gsc"].astype(jnp.float32), pad_o)
        bsc = jnp.pad(params["besc"].astype(jnp.float32), pad_o)
        res, stsc = _conv1x1_bn_stats(xp, wsc, th, ho, wo, stride)
        scr, shr = _bn_scale_shift(stsc, gsc, bsc, count)
    else:
        res = xp
        scr = jnp.ones((1, cout_p), jnp.float32)
        shr = jnp.zeros((1, cout_p), jnp.float32)

    # BN2 + shortcut-BN + residual add + ReLU (single fused elementwise kernel).
    out = _bn_add_relu(y2, res, sc2, sh2, scr, shr, th)
    return jnp.transpose(out[:, :, :, :cout], (0, 3, 1, 2))      # NCHW


# ----------------------- pure-JAX reference (for checking) -----------------------

def _conv_ref(x, w, b, stride, pad):
    out = jax.lax.conv_general_dilated(
        x, w, window_strides=(stride, stride),
        padding=((pad, pad), (pad, pad)),
        dimension_numbers=("NHWC", "HWIO", "NHWC"))
    return out + b.reshape(1, 1, 1, -1)


def _bn_ref(x, gamma, beta):
    mean = jnp.mean(x, axis=(0, 1, 2), keepdims=True)
    var = jnp.mean((x - mean) ** 2, axis=(0, 1, 2), keepdims=True)
    return (x - mean) * jax.lax.rsqrt(var + EPS) * gamma.reshape(1, 1, 1, -1) \
        + beta.reshape(1, 1, 1, -1)


def residual_block_ref(x_nchw, params, *, stride=1):
    x = jnp.transpose(x_nchw, (0, 2, 3, 1)).astype(jnp.float32)
    cin = x.shape[-1]
    cout = params["w1"].shape[-1]
    out = jax.nn.relu(_bn_ref(_conv_ref(x, params["w1"], params["b1"], stride, 1),
                              params["g1"], params["be1"]))
    out = _bn_ref(_conv_ref(out, params["w2"], params["b2"], 1, 1),
                  params["g2"], params["be2"])
    if stride != 1 or cin != cout:
        sc = _bn_ref(_conv_ref(x, params["wsc"], params["bsc"], stride, 0),
                     params["gsc"], params["besc"])
    else:
        sc = x
    return jnp.transpose(jax.nn.relu(out + sc), (0, 3, 1, 2))


# ----------------------------------- main -----------------------------------

if __name__ == "__main__":
    key = jax.random.PRNGKey(0)
    N, Cin, H, W = 2, 4, 16, 16
    Cout = 8          # Cin != Cout -> projection shortcut is exercised
    stride = 1

    ks = jax.random.split(key, 16)
    scale = 0.1
    params = {
        # conv weights stored HWIO (PyTorch stores OIHW; a transpose maps O->last)
        "w1":   scale * jax.random.normal(ks[0], (3, 3, Cin, Cout), jnp.float32),
        "b1":   scale * jax.random.normal(ks[1], (Cout,), jnp.float32),
        "g1":   1.0 + scale * jax.random.normal(ks[2], (Cout,), jnp.float32),
        "be1":  scale * jax.random.normal(ks[3], (Cout,), jnp.float32),
        "w2":   scale * jax.random.normal(ks[4], (3, 3, Cout, Cout), jnp.float32),
        "b2":   scale * jax.random.normal(ks[5], (Cout,), jnp.float32),
        "g2":   1.0 + scale * jax.random.normal(ks[6], (Cout,), jnp.float32),
        "be2":  scale * jax.random.normal(ks[7], (Cout,), jnp.float32),
        "wsc":  scale * jax.random.normal(ks[8], (1, 1, Cin, Cout), jnp.float32),
        "bsc":  scale * jax.random.normal(ks[9], (Cout,), jnp.float32),
        "gsc":  1.0 + scale * jax.random.normal(ks[10], (Cout,), jnp.float32),
        "besc": scale * jax.random.normal(ks[11], (Cout,), jnp.float32),
    }

    x = jax.random.normal(ks[12], (N, Cin, H, W), jnp.float32)   # NCHW, like PyTorch

    # tile_rows=8 -> 2 row tiles per image: exercises the halo boundary logic.
    out = residual_block_forward(x, params, stride=stride, tile_rows=8)
    out = jax.block_until_ready(out)

    ref = residual_block_ref(x, params, stride=stride)
    assert out.shape == ref.shape == (N, Cout, H // stride, W // stride)
    err = jnp.max(jnp.abs(out - ref))
    assert jnp.allclose(out, ref, atol=2e-2, rtol=2e-2), f"max abs err {err}"

    print("KERNEL_OK")
</pallas_src>

<mosaic_0001>
module attributes {stable_mosaic.version = 11 : i64} {
  func.func @kernel(%arg0: i32, %arg1: i32, %arg2: memref<2x16x16x128xf32, #tpu.memory_space<any>>, %arg3: memref<1152x128xf32, #tpu.memory_space<vmem>>, %arg4: memref<1x8x16x128xf32, #tpu.memory_space<vmem>>, %arg5: memref<1x1x2x128xf32, #tpu.memory_space<vmem>>, %arg6: memref<10x18x128xf32, #tpu.memory_space<vmem>>) attributes {dimension_semantics = [#tpu.dimension_semantics<parallel>, #tpu.dimension_semantics<parallel>], iteration_bounds = array<i64: 2, 2>, scalar_prefetch = 0 : i64, scratch_operands = 1 : i64, tpu.core_type = #tpu.core_type<tc>, window_params = [{}, {pipeline_mode = #tpu.pipeline_mode<synchronous>, transform_indices = @transform_1, window_bounds = array<i64: 1152, 128>}, {transform_indices = @transform_2, window_bounds = array<i64: 1, 8, 16, 128>}, {transform_indices = @transform_3, window_bounds = array<i64: 1, 1, 2, 128>}]} {
    %c8_i32 = arith.constant 8 : i32
    %0 = arith.muli %arg1, %c8_i32 : i32
    %c1_i32 = arith.constant 1 : i32
    %1 = arith.subi %0, %c1_i32 : i32
    %cst = arith.constant 0.000000e+00 : f32
    %2 = vector.broadcast %cst : f32 to vector<10x1x128xf32>
    %c0 = arith.constant 0 : index
    %c0_0 = arith.constant 0 : index
    %c0_1 = arith.constant 0 : index
    %3 = vector.load %arg6[%c0, %c0_0, %c0_1] : memref<10x18x128xf32, #tpu.memory_space<vmem>>, vector<10x1x128xf32>
    tpu.vector_store %arg6[%c0, %c0_0, %c0_1], %2 {strides = array<i32>} : memref<10x18x128xf32, #tpu.memory_space<vmem>>, vector<10x1x128xf32>,
    %cst_2 = arith.constant 0.000000e+00 : f32
    %4 = vector.broadcast %cst_2 : f32 to vector<10x1x128xf32>
    %c0_3 = arith.constant 0 : index
    %c17 = arith.constant 17 : index
    %c0_4 = arith.constant 0 : index
    %5 = vector.load %arg6[%c0_3, %c17, %c0_4] : memref<10x18x128xf32, #tpu.memory_space<vmem>>, vector<10x1x128xf32>
    tpu.vector_store %arg6[%c0_3, %c17, %c0_4], %4 {strides = array<i32>} : memref<10x18x128xf32, #tpu.memory_space<vmem>>, vector<10x1x128xf32>,
    %c0_i32 = arith.constant 0 : i32
    %6 = arith.cmpi eq, %arg1, %c0_i32 : i32
    %7 = arith.extui %6 : i1 to i32
    %c0_i32_5 = arith.constant 0 : i32
    %8 = arith.cmpi ne, %7, %c0_i32_5 : i32
    scf.if %8 {
      %cst_27 = arith.constant 0.000000e+00 : f32
      %41 = vector.broadcast %cst_27 : f32 to vector<1x18x128xf32>
      %c0_28 = arith.constant 0 : index
      %c0_29 = arith.constant 0 : index
      %c0_30 = arith.constant 0 : index
      %42 = vector.load %arg6[%c0_28, %c0_29, %c0_30] : memref<10x18x128xf32, #tpu.memory_space<vmem>>, vector<1x18x128xf32>
      tpu.vector_store %arg6[%c0_28, %c0_29, %c0_30], %41 {strides = array<i32>} : memref<10x18x128xf32, #tpu.memory_space<vmem>>, vector<1x18x128xf32>,
      "tpu.region"() ({
        %43 = tpu.sem_alloc : memref<!tpu.dma_semaphore, #tpu.memory_space<semaphore_mem>>
        %c0_i32_31 = arith.constant 0 : i32
        %c0_i32_32 = arith.constant 0 : i32
        %c0_i32_33 = arith.constant 0 : i32
        %44 = tpu.memref_slice %arg2[%arg0, %c0_i32_31, %c0_i32_32, %c0_i32_33] : memref<2x16x16x128xf32, #tpu.memory_space<any>> -> memref<1x9x16x128xf32, #tpu.memory_space<any>>
        %45 = tpu.memref_squeeze %44 : memref<1x9x16x128xf32, #tpu.memory_space<any>> -> memref<9x16x128xf32, #tpu.memory_space<any>>
        %c1_i32_34 = arith.constant 1 : i32
        %c1_i32_35 = arith.constant 1 : i32
        %c0_i32_36 = arith.constant 0 : i32
        %46 = tpu.memref_slice %arg6[%c1_i32_34, %c1_i32_35, %c0_i32_36] : memref<10x18x128xf32, #tpu.memory_space<vmem>> -> memref<9x16x128xf32, #tpu.memory_space<vmem>>
        tpu.enqueue_dma source(%45 : memref<9x16x128xf32, #tpu.memory_space<any>>) target(%46 : memref<9x16x128xf32, #tpu.memory_space<vmem>>) target_semaphore(%43 : memref<!tpu.dma_semaphore, #tpu.memory_space<semaphore_mem>>)
        %c0_i32_37 = arith.constant 0 : i32
        %c0_i32_38 = arith.constant 0 : i32
        %c0_i32_39 = arith.constant 0 : i32
        %47 = tpu.memref_slice %arg2[%arg0, %c0_i32_37, %c0_i32_38, %c0_i32_39] : memref<2x16x16x128xf32, #tpu.memory_space<any>> -> memref<1x9x16x128xf32, #tpu.memory_space<any>>
        %48 = tpu.memref_squeeze %47 : memref<1x9x16x128xf32, #tpu.memory_space<any>> -> memref<9x16x128xf32, #tpu.memory_space<any>>
        %c1_i32_40 = arith.constant 1 : i32
        %c1_i32_41 = arith.constant 1 : i32
        %c0_i32_42 = arith.constant 0 : i32
        %49 = tpu.memref_slice %arg6[%c1_i32_40, %c1_i32_41, %c0_i32_42] : memref<10x18x128xf32, #tpu.memory_space<vmem>> -> memref<9x16x128xf32, #tpu.memory_space<vmem>>
        tpu.wait_dma2 semaphore(%43 : memref<!tpu.dma_semaphore, #tpu.memory_space<semaphore_mem>>) src(%48 : memref<9x16x128xf32, #tpu.memory_space<any>>) dst(%49 : memref<9x16x128xf32, #tpu.memory_space<vmem>>)
        tpu.yield
      }) : () -> ()
    } else {
    }
    %c1_i32_6 = arith.constant 1 : i32
    %9 = arith.cmpi eq, %arg1, %c1_i32_6 : i32
    %10 = arith.extui %9 : i1 to i32
    %c0_i32_7 = arith.constant 0 : i32
    %11 = arith.cmpi ne, %10, %c0_i32_7 : i32
    scf.if %11 {
      %cst_27 = arith.constant 0.000000e+00 : f32
      %41 = vector.broadcast %cst_27 : f32 to vector<1x18x128xf32>
      %c9 = arith.constant 9 : index
      %c0_28 = arith.constant 0 : index
      %c0_29 = arith.constant 0 : index
      %42 = vector.load %arg6[%c9, %c0_28, %c0_29] : memref<10x18x128xf32, #tpu.memory_space<vmem>>, vector<1x18x128xf32>
      tpu.vector_store %arg6[%c9, %c0_28, %c0_29], %41 {strides = array<i32>} : memref<10x18x128xf32, #tpu.memory_space<vmem>>, vector<1x18x128xf32>,
      "tpu.region"() ({
        %43 = tpu.sem_alloc : memref<!tpu.dma_semaphore, #tpu.memory_space<semaphore_mem>>
        %c0_i32_30 = arith.constant 0 : i32
        %c0_i32_31 = arith.constant 0 : i32
        %44 = tpu.memref_slice %arg2[%arg0, %1, %c0_i32_30, %c0_i32_31] : memref<2x16x16x128xf32, #tpu.memory_space<any>> -> memref<1x9x16x128xf32, #tpu.memory_space<any>>
        %45 = tpu.memref_squeeze %44 : memref<1x9x16x128xf32, #tpu.memory_space<any>> -> memref<9x16x128xf32, #tpu.memory_space<any>>
        %c0_i32_32 = arith.constant 0 : i32
        %c1_i32_33 = arith.constant 1 : i32
        %c0_i32_34 = arith.constant 0 : i32
        %46 = tpu.memref_slice %arg6[%c0_i32_32, %c1_i32_33, %c0_i32_34] : memref<10x18x128xf32, #tpu.memory_space<vmem>> -> memref<9x16x128xf32, #tpu.memory_space<vmem>>
        tpu.enqueue_dma source(%45 : memref<9x16x128xf32, #tpu.memory_space<any>>) target(%46 : memref<9x16x128xf32, #tpu.memory_space<vmem>>) target_semaphore(%43 : memref<!tpu.dma_semaphore, #tpu.memory_space<semaphore_mem>>)
        %c0_i32_35 = arith.constant 0 : i32
        %c0_i32_36 = arith.constant 0 : i32
        %47 = tpu.memref_slice %arg2[%arg0, %1, %c0_i32_35, %c0_i32_36] : memref<2x16x16x128xf32, #tpu.memory_space<any>> -> memref<1x9x16x128xf32, #tpu.memory_space<any>>
        %48 = tpu.memref_squeeze %47 : memref<1x9x16x128xf32, #tpu.memory_space<any>> -> memref<9x16x128xf32, #tpu.memory_space<any>>
        %c0_i32_37 = arith.constant 0 : i32
        %c1_i32_38 = arith.constant 1 : i32
        %c0_i32_39 = arith.constant 0 : i32
        %49 = tpu.memref_slice %arg6[%c0_i32_37, %c1_i32_38, %c0_i32_39] : memref<10x18x128xf32, #tpu.memory_space<vmem>> -> memref<9x16x128xf32, #tpu.memory_space<vmem>>
        tpu.wait_dma2 semaphore(%43 : memref<!tpu.dma_semaphore, #tpu.memory_space<semaphore_mem>>) src(%48 : memref<9x16x128xf32, #tpu.memory_space<any>>) dst(%49 : memref<9x16x128xf32, #tpu.memory_space<vmem>>)
        tpu.yield
      }) : () -> ()
    } else {
    }
    %c0_i32_8 = arith.constant 0 : i32
    %12 = arith.cmpi sgt, %arg1, %c0_i32_8 : i32
    %c1_i32_9 = arith.constant 1 : i32
    %13 = arith.cmpi slt, %arg1, %c1_i32_9 : i32
    %14 = arith.andi %12, %13 : i1
    %15 = arith.extui %14 : i1 to i32
    %c0_i32_10 = arith.constant 0 : i32
    %16 = arith.cmpi ne, %15, %c0_i32_10 : i32
    scf.if %16 {
      "tpu.region"() ({
        %41 = tpu.sem_alloc : memref<!tpu.dma_semaphore, #tpu.memory_space<semaphore_mem>>
        %c0_i32_27 = arith.constant 0 : i32
        %c0_i32_28 = arith.constant 0 : i32
        %42 = tpu.memref_slice %arg2[%arg0, %1, %c0_i32_27, %c0_i32_28] : memref<2x16x16x128xf32, #tpu.memory_space<any>> -> memref<1x10x16x128xf32, #tpu.memory_space<any>>
        %43 = tpu.memref_squeeze %42 : memref<1x10x16x128xf32, #tpu.memory_space<any>> -> memref<10x16x128xf32, #tpu.memory_space<any>>
        %c0_i32_29 = arith.constant 0 : i32
        %c1_i32_30 = arith.constant 1 : i32
        %c0_i32_31 = arith.constant 0 : i32
        %44 = tpu.memref_slice %arg6[%c0_i32_29, %c1_i32_30, %c0_i32_31] : memref<10x18x128xf32, #tpu.memory_space<vmem>> -> memref<10x16x128xf32, #tpu.memory_space<vmem>>
        tpu.enqueue_dma source(%43 : memref<10x16x128xf32, #tpu.memory_space<any>>) target(%44 : memref<10x16x128xf32, #tpu.memory_space<vmem>>) target_semaphore(%41 : memref<!tpu.dma_semaphore, #tpu.memory_space<semaphore_mem>>)
        %c0_i32_32 = arith.constant 0 : i32
        %c0_i32_33 = arith.constant 0 : i32
        %45 = tpu.memref_slice %arg2[%arg0, %1, %c0_i32_32, %c0_i32_33] : memref<2x16x16x128xf32, #tpu.memory_space<any>> -> memref<1x10x16x128xf32, #tpu.memory_space<any>>
        %46 = tpu.memref_squeeze %45 : memref<1x10x16x128xf32, #tpu.memory_space<any>> -> memref<10x16x128xf32, #tpu.memory_space<any>>
        %c0_i32_34 = arith.constant 0 : i32
        %c1_i32_35 = arith.constant 1 : i32
        %c0_i32_36 = arith.constant 0 : i32
        %47 = tpu.memref_slice %arg6[%c0_i32_34, %c1_i32_35, %c0_i32_36] : memref<10x18x128xf32, #tpu.memory_space<vmem>> -> memref<10x16x128xf32, #tpu.memory_space<vmem>>
        tpu.wait_dma2 semaphore(%41 : memref<!tpu.dma_semaphore, #tpu.memory_space<semaphore_mem>>) src(%46 : memref<10x16x128xf32, #tpu.memory_space<any>>) dst(%47 : memref<10x16x128xf32, #tpu.memory_space<vmem>>)
        tpu.yield
      }) : () -> ()
    } else {
    }
    %c0_11 = arith.constant 0 : index
    %c0_12 = arith.constant 0 : index
    %c0_13 = arith.constant 0 : index
    %17 = vector.load %arg6[%c0_11, %c0_12, %c0_13] : memref<10x18x128xf32, #tpu.memory_space<vmem>>, vector<10x18x128xf32>
    %18 = vector.extract_strided_slice %17 {offsets = [0, 0, 0], sizes = [8, 16, 128], strides = [1, 1, 1]} : vector<10x18x128xf32> to vector<8x16x128xf32>
    %19 = vector.extract_strided_slice %17 {offsets = [0, 1, 0], sizes = [8, 16, 128], strides = [1, 1, 1]} : vector<10x18x128xf32> to vector<8x16x128xf32>
    %20 = vector.extract_strided_slice %17 {offsets = [0, 2, 0], sizes = [8, 16, 128], strides = [1, 1, 1]} : vector<10x18x128xf32> to vector<8x16x128xf32>
    %21 = vector.extract_strided_slice %17 {offsets = [1, 0, 0], sizes = [8, 16, 128], strides = [1, 1, 1]} : vector<10x18x128xf32> to vector<8x16x128xf32>
    %22 = vector.extract_strided_slice %17 {offsets = [1, 1, 0], sizes = [8, 16, 128], strides = [1, 1, 1]} : vector<10x18x128xf32> to vector<8x16x128xf32>
    %23 = vector.extract_strided_slice %17 {offsets = [1, 2, 0], sizes = [8, 16, 128], strides = [1, 1, 1]} : vector<10x18x128xf32> to vector<8x16x128xf32>
    %24 = vector.extract_strided_slice %17 {offsets = [2, 0, 0], sizes = [8, 16, 128], strides = [1, 1, 1]} : vector<10x18x128xf32> to vector<8x16x128xf32>
    %25 = vector.extract_strided_slice %17 {offsets = [2, 1, 0], sizes = [8, 16, 128], strides = [1, 1, 1]} : vector<10x18x128xf32> to vector<8x16x128xf32>
    %26 = vector.extract_strided_slice %17 {offsets = [2, 2, 0], sizes = [8, 16, 128], strides = [1, 1, 1]} : vector<10x18x128xf32> to vector<8x16x128xf32>
    %27 = tpu.concatenate %18, %19, %20, %21, %22, %23, %24, %25, %26 in 2 : vector<8x16x128xf32>, vector<8x16x128xf32>, vector<8x16x128xf32>, vector<8x16x128xf32>, vector<8x16x128xf32>, vector<8x16x128xf32>, vector<8x16x128xf32>, vector<8x16x128xf32>, vector<8x16x128xf32> -> vector<8x16x1152xf32>
    %28 = vector.shape_cast %27 : vector<8x16x1152xf32> to vector<128x1152xf32>
    %c0_14 = arith.constant 0 : index
    %c0_15 = arith.constant 0 : index
    %29 = vector.load %arg3[%c0_14, %c0_15] : memref<1152x128xf32, #tpu.memory_space<vmem>>, vector<1152x128xf32>
    %cst_16 = arith.constant dense<0.000000e+00> : vector<128x128xf32>
    %30 = tpu.matmul %28, %29, %cst_16 {dimension_numbers = #tpu.dot_dimension_numbers<[1], [0], [0], [1], [0, 0, 1, 1], [], []>} : vector<128x1152xf32>, vector<1152x128xf32>, vector<128x128xf32> -> vector<128x128xf32>
    %cst_17 = arith.constant dense<0.000000e+00> : vector<128xf32>
    %31 = vector.multi_reduction <add>, %30, %cst_17 [0] : vector<128x128xf32> to vector<128xf32>
    %32 = vector.shape_cast %31 : vector<128xf32> to vector<1x128xf32>
    %33 = arith.mulf %30, %30 : vector<128x128xf32>
    %cst_18 = arith.constant dense<0.000000e+00> : vector<128xf32>
    %34 = vector.multi_reduction <add>, %33, %cst_18 [0] : vector<128x128xf32> to vector<128xf32>
    %35 = vector.shape_cast %34 : vector<128xf32> to vector<1x128xf32>
    %36 = tpu.concatenate %32, %35 in 0 : vector<1x128xf32>, vector<1x128xf32> -> vector<2x128xf32>
    %37 = vector.shape_cast %36 : vector<2x128xf32> to vector<1x1x2x128xf32>
    %c0_19 = arith.constant 0 : index
    %c0_20 = arith.constant 0 : index
    %c0_21 = arith.constant 0 : index
    %c0_22 = arith.constant 0 : index
    %38 = vector.load %arg5[%c0_19, %c0_20, %c0_21, %c0_22] : memref<1x1x2x128xf32, #tpu.memory_space<vmem>>, vector<1x1x2x128xf32>
    tpu.vector_store %arg5[%c0_19, %c0_20, %c0_21, %c0_22], %37 {strides = array<i32>} : memref<1x1x2x128xf32, #tpu.memory_space<vmem>>, vector<1x1x2x128xf32>,
    %39 = vector.shape_cast %30 : vector<128x128xf32> to vector<1x8x16x128xf32>
    %c0_23 = arith.constant 0 : index
    %c0_24 = arith.constant 0 : index
    %c0_25 = arith.constant 0 : index
    %c0_26 = arith.constant 0 : index
    %40 = vector.load %arg4[%c0_23, %c0_24, %c0_25, %c0_26] : memref<1x8x16x128xf32, #tpu.memory_space<vmem>>, vector<1x8x16x128xf32>
    tpu.vector_store %arg4[%c0_23, %c0_24, %c0_25, %c0_26], %39 {strides = array<i32>} : memref<1x8x16x128xf32, #tpu.memory_space<vmem>>, vector<1x8x16x128xf32>,
    return
  }
  func.func @transform_1(%arg0: i32, %arg1: i32) -> (i32, i32) {
    %c0_i32 = arith.constant 0 : i32
    %c0_i32_0 = arith.constant 0 : i32
    %c0_i32_1 = arith.constant 0 : i32
    return %c0_i32, %c0_i32_0 : i32, i32
  }
  func.func @transform_2(%arg0: i32, %arg1: i32) -> (i32, i32, i32, i32) {
    %c0_i32 = arith.constant 0 : i32
    %c0_i32_0 = arith.constant 0 : i32
    %c0_i32_1 = arith.constant 0 : i32
    return %arg0, %arg1, %c0_i32, %c0_i32_0 : i32, i32, i32, i32
  }
  func.func @transform_3(%arg0: i32, %arg1: i32) -> (i32, i32, i32, i32) {
    %c0_i32 = arith.constant 0 : i32
    %c0_i32_0 = arith.constant 0 : i32
    %c0_i32_1 = arith.constant 0 : i32
    return %arg0, %arg1, %c0_i32, %c0_i32_0 : i32, i32, i32, i32
  }
}

</mosaic_0001>

<bundles_post_ra>
// kernel: tpu_custom_call.1
= control target key start
LH: loop header
LB: loop body
LE: loop exit
PB: predicated region body
PF: predicated region fallthrough
CT: control target
= control target key end

     0   :  { %s3111_s0 = inlined_call_operand.hbm [shape: f32[2,16,16,128], index: 0, kind: input, shape index: {}]   ;;  %s3112_s1 = inlined_call_operand.hbm [shape: f32[1152,128], index: 1, kind: input, shape index: {}]   ;;  %s3113_s2 = inlined_call_operand.hbm [shape: f32[2,16,16,128], index: 2, kind: output, shape index: {0}]   ;;  %s3114_s3 = inlined_call_operand.hbm [shape: f32[2,2,2,128], index: 3, kind: output, shape index: {1}]  }
   0x1   :  { %3119 = sst [smem:[#allocation46_spill]] %s3112_s1 }
   0x2   :  { %9 = vsyncpa [#allocation4], 0 }
   0x3   :  { %10 = vsyncpa [#allocation5], 0 }
   0x4   :  { %12 = vsyncpa [#allocation5 + $0x1], 0 }
   0x5   :  { %13 = vsyncpa [#allocation8], 0 }
   0x6   :  { %15 = vsyncpa [#allocation8 + $0x1], 0  ;;  %s2408_s12 = smov 0   ;;  %s2410_s13 = smov 0  }
   0x7   :  { %s2412_s14 = smov 0   ;;  %s2414_s15 = smov 0  }
   0x8   :  { %s2416_s16 = smov 0   ;;  %s2418_s17 = smov 0  }
   0x9   :  { %s2420_s18 = smov 0   ;;  %s2422_s19 = smov 0  }
   0xa LB: > { %3120 = sst [smem:[#allocation21_spill]] %s2353_s17  ;;  %s1559_s20 = sadd.s32 4294967295, %s2361_s19   ;;  %s2361_s19 = sphi %s2422_s19, %s21_s19   ;;  %s2357_s18 = sphi %s2420_s18, %s3175_s18   ;;  %s2353_s17 = sphi %s2418_s17, %s3174_s17   ;;  %s2349_s16 = sphi %s2416_s16, %s3173_s16   ;;  %s2345_s15 = sphi %s2414_s15, %s3172_s15   ;;  %s2341_s14 = sphi %s2412_s14, %s3178_s14   ;;  %s2337_s13 = sphi %s2410_s13, %s3177_s13   ;;  %s2333_s12 = sphi %s2408_s12, %s3176_s12  }
   0xb   : > { %3121 = sst [smem:[#allocation22_spill]] %s2357_s18  ;;  %s1560_s21 = sadd.s32 4294967294, %s2361_s19  }
   0xc   : > { %s30_s22 = sadd.s32 1, %s2353_s17  ;;  %s33_s23 = sadd.s32 1, %s2357_s18 }
   0xd   : > { %p31_p0 = scmp.ge.s32.totalorder %s30_s22, 2  ;;  %s63_s24 = sadd.s32 1, %s2341_s14 }
   0xe   : > { %p73_p1 = scmp.ne.s32.totalorder %s2341_s14, %s2337_s13  ;;  %p74_p2 = scmp.eq.s32.totalorder %s1559_s20, 3 }
   0xf   : > { %s3180_s22 = smov (%p31_p0, %s30_s22), 0  ;;  %s3182_s23 = smov (!%p31_p0, %s33_s23), %s2357_s18 }
  0x10   : > { %3122 = sst [smem:[#allocation23_spill]] %s3180_s22  ;;  %s59_s25 = ssub.s32 %s2353_s17, %s3180_s22 }
  0x11   : > { %p2460_p3 = por %p74_p2, %p73_p1  ;;  %p35_p4 = scmp.ge.s32.totalorder %s3182_s23, 2 }
  0x12   : > { %p79_p5 = scmp.ne.s32.totalorder %s2337_s13, %s2333_s12  ;;  %p80_p6 = scmp.eq.s32.totalorder %s1560_s21, 3 }
  0x13   : > { %p1561_p7 = scmp.ge.s32.totalorder %s2361_s19, 1  ;;  %s3184_s23 = smov (%p35_p4, %s3182_s23), 0 }
  0x14   : > { %3124 = sst [smem:[#allocation24_spill]] %s3184_s23  ;;  %p2469_p8 = por %p80_p6, %p79_p5 }
  0x15   : > { %p115_p9 = scmp.lt.s32.totalorder %s2361_s19, 5  ;;  %s58_s28 = ssub.s32 %s2357_s18, %s3184_s23 }
  0x16   : > { %s60_s29 = sor.u32 %s59_s25, %s58_s28  ;;  %p2480_p12 = scmp.eq.s32.totalorder %s1559_s20, 0 }
  0x17   : > { %p2476_p10 = pnand %p1561_p7, %p115_p9  ;;  %p61_p11 = scmp.eq.s32.totalorder %s60_s29, 0 }
  0x18   : > { %s2363_s6 = smov [#allocation3]  }
  0x19   : > { %p2039_p13 = pneg %p2476_p10  ;;  %s127_s7 = sshll.u32 %s2363_s6, 4  ;;  %s128_s7 = int_to_ptr.vmem [resolvable:$true] %s127_s7 }
  0x1a   : > { %s2487_s5 = scalar_select %p61_p11, %s2341_s14, %s63_s24  }
  0x1b   : > { %p2491_p0 = pnand %p2480_p12, %p2039_p13  ;;  %s2148_s9 = scalar_lea.vmem %s128_s7, 18432 }
  0x1c   : > { %p2149_p2 = scmp.ne.s32.totalorder %s128_s7, %s2148_s9  ;;  %p2156_p6 = scmp.lt.s32.totalorder %s128_s7, %s128_s7 }
  0x1d   : > { %p2139_p1 = pneg %p2491_p0  ;;  %p2157_p7 = scmp.lt.s32.totalorder %s2148_s9, %s2148_s9 }
  0x1f   : > { %p2151_p4 = pnand %p2149_p2, %p2139_p1  ;;  %p2158_p9 = por %p2157_p7, %p2156_p6 }
  0x21   : > { %p2152_p5 = pneg %p2151_p4 }
  0x23   : > { %p2159_p11 = pnand %p2158_p9, %p2152_p5 }
  0x25   : > { %2162 = shalt.err (!%p2159_p11)
}
  0x26   : > { %s2364_s10 = smov 128   ;;  %s2365_s11 = smov 8  }
  0x27   : > { %s3129_s1 = sld [smem:[#allocation46_spill]] }
  0x29   : > { %143 = sbr.rel (%p2476_p10) target bundleno = 591 (0x24f), region = 24 }
  0x2d   : > { %2042 = dma.hbm_to_vmem [thread:$0]  (!%p2491_p0), %s3129_s1, 18432, %s128_s7, [#allocation4], %s2364_s10, %s2364_s10, %s2365_s11  }
  0x2e   : > { %2314 = dma.done.wait (%p2480_p12), [#allocation4], 18432  }
  0x2f   : > { %2316 = vsyncadd (%p2480_p12), [#allocation4], 4294948864  ;;  %s2509_s24 = sand.u32 1, %s2337_s13   ;;  %s1567_s25 = sshll.u32 %s2345_s15, 3  ;;  %v2366_v0 = vmov 0.0  }
  0x30   : > { %s1565_s28 = sshll.u32 %s2509_s24, 7  ;;  %s1566_s29 = sshll.u32 %s2509_s24, 1  ;;  %168 = vst [vmem:[#allocation2] sm:$0x1] %v2366_v0  ;;  %169 = vst [vmem:[#allocation2 + $0x18] sm:$0x1] %v2366_v0 }
  0x31   : > { %170 = vst [vmem:[#allocation2 + $0x30] sm:$0x1] %v2366_v0  ;;  %171 = vst [vmem:[#allocation2 + $0x48] sm:$0x1] %v2366_v0  ;;  %s2514_s30 = sadd.s32 4294967295, %s1567_s25  ;;  %s2516_s4 = scalar_lea.vmem [#allocation6], %s1565_s28 }
  0x32   : > { %172 = vst [vmem:[#allocation2 + $0x60] sm:$0x1] %v2366_v0  ;;  %173 = vst [vmem:[#allocation2 + $0x78] sm:$0x1] %v2366_v0  ;;  %s2518_s6 = scalar_lea.vmem [#allocation7], %s1566_s29  ;;  %p1569_p10 = scmp.ne.s32.totalorder %s2345_s15, 0 }
  0x33   : > { %174 = vst [vmem:[#allocation2 + $0x90] sm:$0x1] %v2366_v0  ;;  %175 = vst [vmem:[#allocation2 + $0xa8] sm:$0x1] %v2366_v0 }
  0x34   : > { %176 = vst [vmem:[#allocation2 + $0xc0] sm:$0x1] %v2366_v0  ;;  %177 = vst [vmem:[#allocation2 + $0xd8] sm:$0x1] %v2366_v0 }
  0x35   : > { %178 = vst [vmem:[#allocation2 + $0x11] sm:$0x1] %v2366_v0  ;;  %179 = vst [vmem:[#allocation2 + $0x29] sm:$0x1] %v2366_v0  ;;  %191 = sbr.rel (%p1569_p10) target bundleno = 87 (0x57), region = 32 }
  0x36   : > { %180 = vst [vmem:[#allocation2 + $0x41] sm:$0x1] %v2366_v0  ;;  %181 = vst [vmem:[#allocation2 + $0x59] sm:$0x1] %v2366_v0 }
  0x37   : > { %182 = vst [vmem:[#allocation2 + $0x71] sm:$0x1] %v2366_v0  ;;  %183 = vst [vmem:[#allocation2 + $0x89] sm:$0x1] %v2366_v0 }
  0x38   : > { %184 = vst [vmem:[#allocation2 + $0xa1] sm:$0x1] %v2366_v0  ;;  %185 = vst [vmem:[#allocation2 + $0xb9] sm:$0x1] %v2366_v0 }
  0x39   : > { %186 = vst [vmem:[#allocation2 + $0xd1] sm:$0x1] %v2366_v0  ;;  %187 = vst [vmem:[#allocation2 + $0xe9] sm:$0x1] %v2366_v0 }
  0x3a   : > { %v2367_v1 = vmov 0.0  }
  0x3b   : > { %192 = vst [vmem:[#allocation2] sm:$0xff] %v2367_v1  ;;  %193 = vst [vmem:[#allocation2 + $0x8] sm:$0xff] %v2367_v1 }
  0x3c   : > { %194 = vst [vmem:[#allocation2 + $0x10] sm:$0x3] %v2367_v1 }
  0x3d   : > { %s1589_s7 = sshll.u32 %s2349_s16, 12  ;;  %s2368_s11 = smov [#allocation2 + $0x19]  }
  0x3e   : > { %s2525_s10 = scalar_lea.hbm %s3111_s0, %s1589_s7  ;;  %s200_s20 = sshll.u32 %s2368_s11, 4  ;;  %s201_s20 = int_to_ptr.vmem [resolvable:$true] %s200_s20 }
  0x3f   : > { %s2163_s21 = scalar_lea.hbm %s2525_s10, 2304  ;;  %s2165_s29 = scalar_lea.hbm %s3111_s0, 8192 }
  0x40   : > { %p2164_p12 = scmp.ne.s32.totalorder %s2525_s10, %s2163_s21  ;;  %p2166_p13 = scmp.lt.s32.totalorder %s2525_s10, %s3111_s0 }
  0x41   : > { %p2167_p0 = scmp.lt.s32.totalorder %s2165_s29, %s2163_s21 }
  0x43   : > { %p2168_p1 = por %p2167_p0, %p2166_p13 }
  0x45   : > { %p2169_p2 = pnand %p2168_p1, %p2164_p12 }
  0x47   : > { %2172 = shalt.err (!%p2169_p2)  }
  0x48   : > { %s2173_s7 = scalar_lea.vmem %s201_s20, 2304  ;;  %s2369_s8 = smov [#allocation2]  }
  0x49   : > { %p2174_p4 = scmp.ne.s32.totalorder %s201_s20, %s2173_s7  ;;  %s2175_s9 = sshll.u32 %s2369_s8, 4  ;;  %s2176_s9 = int_to_ptr.vmem [resolvable:$false] %s2175_s9 }
  0x4a   : > { %s2177_s11 = scalar_lea.vmem %s2176_s9, 3840  ;;  %p2178_p5 = scmp.lt.s32.totalorder %s201_s20, %s2176_s9 }
  0x4b   : > { %p2179_p6 = scmp.lt.s32.totalorder %s2177_s11, %s2173_s7 }
  0x4d   : > { %p2180_p7 = por %p2179_p6, %p2178_p5 }
  0x4f   : > { %p2181_p9 = pnand %p2180_p7, %p2174_p4 }
  0x51   : > { %2184 = shalt.err (!%p2181_p9)  }
  0x52   : > { %s2370_s25 = smov 256   ;;  %s2371_s28 = smov 384  }
  0x53   : > { %s2372_s1 = smov 16  }
  0x54   : > { %203 = dma.hbm_to_vmem [thread:$0]  %s2525_s10, 2304, %s201_s20, [#allocation9], %s2370_s25, %s2371_s28, %s2372_s1 }
  0x55   : > { %2317 = dma.done.wait [#allocation9], 2304 }
  0x56   : > { %2318 = vsyncadd [#allocation9], 4294964992 }
  0x57 PF: > { %p1572_p11 = scmp.ne.s32.totalorder %s2345_s15, 1 }
  0x59   : > { %211 = sbr.rel (%p1572_p11) target bundleno = 124 (0x7c), region = 37 }
  0x5e   : > { %v2373_v2 = vmov 0.0  }
  0x5f   : > { %213 = vst [vmem:[#allocation2 + $0xd8] sm:$0xff] %v2373_v2  ;;  %214 = vst [vmem:[#allocation2 + $0xe0] sm:$0xff] %v2373_v2 }
  0x60   : > { %215 = vst [vmem:[#allocation2 + $0xe8] sm:$0x3] %v2373_v2 }
  0x61   : > { %s1573_s23 = sshll.u32 %s2514_s30, 4  ;;  %s1574_s21 = sshll.u32 %s2349_s16, 8 }
  0x62   : > { %s218_s29 = sadd.s32 %s1574_s21, %s1573_s23  ;;  %s2374_s8 = smov [#allocation2 + $0x1]  }
  0x63   : > { %s1575_s7 = sshll.u32 %s218_s29, 4  ;;  %s223_s9 = sshll.u32 %s2374_s8, 4  ;;  %s224_s9 = int_to_ptr.vmem [resolvable:$true] %s223_s9 }
  0x64   : > { %s220_s20 = scalar_lea.hbm %s3111_s0, %s1575_s7  ;;  %s2187_s22 = scalar_lea.hbm %s3111_s0, 8192 }
  0x65   : > { %s2185_s25 = scalar_lea.hbm %s220_s20, 2304  ;;  %p2188_p12 = scmp.lt.s32.totalorder %s220_s20, %s3111_s0 }
  0x66   : > { %p2186_p10 = scmp.ne.s32.totalorder %s220_s20, %s2185_s25  ;;  %p2189_p13 = scmp.lt.s32.totalorder %s2187_s22, %s2185_s25 }
  0x68   : > { %p2190_p0 = por %p2189_p13, %p2188_p12 }
  0x6a   : > { %p2191_p1 = pnand %p2190_p0, %p2186_p10 }
  0x6c   : > { %2194 = shalt.err (!%p2191_p1)  }
  0x6d   : > { %s2195_s23 = scalar_lea.vmem %s224_s9, 2304  ;;  %s2375_s21 = smov [#allocation2]  }
  0x6e   : > { %p2196_p2 = scmp.ne.s32.totalorder %s224_s9, %s2195_s23  ;;  %s2197_s29 = sshll.u32 %s2375_s21, 4  ;;  %s2198_s29 = int_to_ptr.vmem [resolvable:$false] %s2197_s29 }
  0x6f   : > { %s2199_s7 = scalar_lea.vmem %s2198_s29, 3840  ;;  %p2200_p4 = scmp.lt.s32.totalorder %s224_s9, %s2198_s29 }
  0x70   : > { %p2201_p5 = scmp.lt.s32.totalorder %s2199_s7, %s2195_s23 }
  0x72   : > { %p2202_p6 = por %p2201_p5, %p2200_p4 }
  0x74   : > { %p2203_p7 = pnand %p2202_p6, %p2196_p2 }
  0x76   : > { %2206 = shalt.err (!%p2203_p7)  }
  0x77   : > { %s2376_s8 = smov 256   ;;  %s2377_s11 = smov 384  }
  0x78   : > { %s2378_s10 = smov 16  }
  0x79   : > { %226 = dma.hbm_to_vmem [thread:$0]  %s220_s20, 2304, %s224_s9, [#allocation11], %s2376_s8, %s2377_s11, %s2378_s10 }
  0x7a   : > { %2319 = dma.done.wait [#allocation11], 2304 }
  0x7b   : > { %2320 = vsyncadd [#allocation11], 4294964992 }
  0x7c PF: > { %p231_p9 = scmp.gt.s32.totalorder %s2345_s15, 0  ;;  %p232_p11 = scmp.lt.s32.totalorder %s2345_s15, 1 }
  0x7e   : > { %p233_p10 = pnand %p232_p11, %p231_p9 }
  0x80   : > { %236 = sbr.rel (%p233_p10) target bundleno = 160 (0xa0), region = 42 }
  0x85   : > { %s1576_s17 = sshll.u32 %s2514_s30, 4  ;;  %s1577_s18 = sshll.u32 %s2349_s16, 8 }
  0x86   : > { %s239_s22 = sadd.s32 %s1577_s18, %s1576_s17  ;;  %s2379_s28 = smov [#allocation2 + $0x1]  }
  0x87   : > { %s1578_s25 = sshll.u32 %s239_s22, 4  ;;  %s244_s1 = sshll.u32 %s2379_s28, 4  ;;  %s245_s1 = int_to_ptr.vmem [resolvable:$true] %s244_s1 }
  0x88   : > { %s241_s9 = scalar_lea.hbm %s3111_s0, %s1578_s25  ;;  %s2209_s8 = scalar_lea.hbm %s3111_s0, 8192 }
  0x89   : > { %s2207_s20 = scalar_lea.hbm %s241_s9, 2560  ;;  %p2210_p13 = scmp.lt.s32.totalorder %s241_s9, %s3111_s0 }
  0x8a   : > { %p2208_p12 = scmp.ne.s32.totalorder %s241_s9, %s2207_s20  ;;  %p2211_p0 = scmp.lt.s32.totalorder %s2209_s8, %s2207_s20 }
  0x8c   : > { %p2212_p1 = por %p2211_p0, %p2210_p13 }
  0x8e   : > { %p2213_p2 = pnand %p2212_p1, %p2208_p12 }
  0x90   : > { %2216 = shalt.err (!%p2213_p2)  }
  0x91   : > { %s2217_s30 = scalar_lea.vmem %s245_s1, 2560  ;;  %s2380_s17 = smov [#allocation2]  }
  0x92   : > { %p2218_p4 = scmp.ne.s32.totalorder %s245_s1, %s2217_s30  ;;  %s2219_s18 = sshll.u32 %s2380_s17, 4  ;;  %s2220_s18 = int_to_ptr.vmem [resolvable:$false] %s2219_s18 }
  0x93   : > { %s2221_s22 = scalar_lea.vmem %s2220_s18, 3840  ;;  %p2222_p5 = scmp.lt.s32.totalorder %s245_s1, %s2220_s18 }
  0x94   : > { %p2223_p6 = scmp.lt.s32.totalorder %s2221_s22, %s2217_s30 }
  0x96   : > { %p2224_p7 = por %p2223_p6, %p2222_p5 }
  0x98   : > { %p2225_p9 = pnand %p2224_p7, %p2218_p4 }
  0x9a   : > { %2228 = shalt.err (!%p2225_p9)  }
  0x9b   : > { %s2381_s25 = smov 256   ;;  %s2382_s28 = smov 384  }
  0x9c   : > { %s2383_s23 = smov 16  }
  0x9d   : > { %247 = dma.hbm_to_vmem [thread:$0]  %s241_s9, 2560, %s245_s1, [#allocation13], %s2381_s25, %s2382_s28, %s2383_s23 }
  0x9e   : > { %2321 = dma.done.wait [#allocation13], 2560 }
  0x9f   : > { %2322 = vsyncadd [#allocation13], 4294964736 }
  0xa0 PF: > { %v485_v3 = vld [vmem:[#allocation3 + $0xf8] sm:$0xff]  ;;  %v484_v7 = vld [vmem:[#allocation3 + $0xf0] sm:$0xff]  ;;  %v483_v11 = vld [vmem:[#allocation3 + $0xe8] sm:$0xff]  ;;  %vm306_vm0 = vcmask 1046528   ;;  %vm363_vm1 = vcmask 1045504   ;;  %s1590_s1 = sshll.u32 %s2345_s15, 4 }
  0xa1   : > { %v517_v4 = vld [vmem:[#allocation3 + $0x1f8] sm:$0xff]  ;;  %1591 = vmatprep.subr.mxu0 %v485_v3  ;;  %v516_v8 = vld [vmem:[#allocation3 + $0x1f0] sm:$0xff]  ;;  %v515_v12 = vld [vmem:[#allocation3 + $0x1e8] sm:$0xff]  ;;  %s1583_s21 = sshll.u32 %s2349_s16, 5  ;;  %s1422_s20 = sshll.u32 %s2516_s4, 4  ;;  %s3002_s20 = int_to_ptr.vmem [resolvable:$true] %s1422_s20 }
  0xa2   : > { %v469_v5 = vld [vmem:[#allocation3 + $0x78] sm:$0xff]  ;;  %1671 = vmatprep.subr.mxu1 %v517_v4  ;;  %v468_v9 = vld [vmem:[#allocation3 + $0x70] sm:$0xff]  ;;  %v467_v13 = vld [vmem:[#allocation3 + $0x68] sm:$0xff]  ;;  %s2985_s9 = sadd.s32 %s1590_s1, %s1583_s21  ;;  %s1401_s10 = scalar_lea.sflag [#allocation5], %s2509_s24 }
  0xa3   : > { %v501_v6 = vld [vmem:[#allocation3 + $0x178] sm:$0xff]  ;;  %1592 = vmatpush3.msra.mxu0 %v469_v5  ;;  %v500_v10 = vld [vmem:[#allocation3 + $0x170] sm:$0xff]  ;;  %v499_v14 = vld [vmem:[#allocation3 + $0x168] sm:$0xff]  ;;  %s1584_s29 = sshll.u32 %s2985_s9, 7  ;;  %s2229_s30 = scalar_lea.vmem %s3002_s20, 2048 }
  0xa4   : > { %1672 = vmatpush3.msra.mxu1 %v501_v6  ;;  %1593 = vmatprep.subr.mxu0 %v484_v7  ;;  %v482_v15 = vld [vmem:[#allocation3 + $0xe0] sm:$0xff]  ;;  %v481_v19 = vld [vmem:[#allocation3 + $0xd8] sm:$0xff]  ;;  %v480_v23 = vld [vmem:[#allocation3 + $0xd0] sm:$0xff]  ;;  %s3009_s11 = scalar_lea.hbm %s3113_s2, %s1584_s29  ;;  %p2230_p11 = scmp.ne.s32.totalorder %s3002_s20, %s2229_s30 }
  0xa5   : > { %1673 = vmatprep.subr.mxu1 %v516_v8  ;;  %1594 = vmatpush3.msra.mxu0 %v468_v9  ;;  %v514_v16 = vld [vmem:[#allocation3 + $0x1e0] sm:$0xff]  ;;  %v513_v20 = vld [vmem:[#allocation3 + $0x1d8] sm:$0xff]  ;;  %v512_v24 = vld [vmem:[#allocation3 + $0x1d0] sm:$0xff]  ;;  %s2384_s17 = smov [#allocation6]  }
  0xa6   : > { %1674 = vmatpush3.msra.mxu1 %v500_v10  ;;  %1595 = vmatprep.subr.mxu0 %v483_v11  ;;  %v466_v17 = vld [vmem:[#allocation3 + $0x60] sm:$0xff]  ;;  %v465_v21 = vld [vmem:[#allocation3 + $0x58] sm:$0xff]  ;;  %v464_v25 = vld [vmem:[#allocation3 + $0x50] sm:$0xff]  ;;  %p2231_p10 = pnand %p2230_p11, %p2460_p3  ;;  %s2233_s18 = sshll.u32 %s2384_s17, 4  ;;  %s2234_s18 = int_to_ptr.vmem [resolvable:$false] %s2233_s18 }
  0xa7   : > { %1675 = vmatprep.subr.mxu1 %v515_v12  ;;  %v498_v18 = vld [vmem:[#allocation3 + $0x160] sm:$0xff]  ;;  %1596 = vmatpush3.msra.mxu0 %v467_v13  ;;  %v497_v22 = vld [vmem:[#allocation3 + $0x158] sm:$0xff]  ;;  %v496_v26 = vld [vmem:[#allocation3 + $0x150] sm:$0xff]  ;;  %s2235_s22 = scalar_lea.vmem %s2234_s18, 4096  ;;  %p2236_p13 = scmp.lt.s32.totalorder %s3002_s20, %s2234_s18 }
  0xa8   : > { %1676 = vmatpush3.msra.mxu1 %v499_v14  ;;  %1597 = vmatprep.subr.mxu0 %v482_v15  ;;  %v479_v27 = vld [vmem:[#allocation3 + $0xc8] sm:$0xff]  ;;  %v478_v31 = vld [vmem:[#allocation3 + $0xc0] sm:$0xff]  ;;  %v477_v35 = vld [vmem:[#allocation3 + $0xb8] sm:$0xff]  ;;  %p2232_p12 = pneg %p2231_p10  ;;  %p2237_p0 = scmp.lt.s32.totalorder %s2235_s22, %s2229_s30 }
  0xa9   : > { %1677 = vmatprep.subr.mxu1 %v514_v16  ;;  %1598 = vmatpush3.msra.mxu0 %v466_v17  ;;  %v511_v28 = vld [vmem:[#allocation3 + $0x1c8] sm:$0xff]  ;;  %v510_v32 = vld [vmem:[#allocation3 + $0x1c0] sm:$0xff]  ;;  %v509_v36 = vld [vmem:[#allocation3 + $0x1b8] sm:$0xff] }
  0xaa   : > { %1678 = vmatpush3.msra.mxu1 %v498_v18  ;;  %1599 = vmatprep.subr.mxu0 %v481_v19  ;;  %v463_v29 = vld [vmem:[#allocation3 + $0x48] sm:$0xff]  ;;  %v462_v33 = vld [vmem:[#allocation3 + $0x40] sm:$0xff]  ;;  %v461_v37 = vld [vmem:[#allocation3 + $0x38] sm:$0xff]  ;;  %p2238_p1 = por %p2237_p0, %p2236_p13 }
  0xab   : > { %1679 = vmatprep.subr.mxu1 %v513_v20  ;;  %1600 = vmatpush3.msra.mxu0 %v465_v21  ;;  %v495_v30 = vld [vmem:[#allocation3 + $0x148] sm:$0xff]  ;;  %v494_v34 = vld [vmem:[#allocation3 + $0x140] sm:$0xff]  ;;  %v493_v38 = vld [vmem:[#allocation3 + $0x138] sm:$0xff] }
  0xac   : > { %1680 = vmatpush3.msra.mxu1 %v497_v22  ;;  %1601 = vmatprep.subr.mxu0 %v480_v23  ;;  %v476_v39 = vld [vmem:[#allocation3 + $0xb0] sm:$0xff]  ;;  %v475_v43 = vld [vmem:[#allocation3 + $0xa8] sm:$0xff]  ;;  %v474_v47 = vld [vmem:[#allocation3 + $0xa0] sm:$0xff]  ;;  %p2239_p2 = pnand %p2238_p1, %p2232_p12 }
  0xad   : > { %1681 = vmatprep.subr.mxu1 %v512_v24  ;;  %1602 = vmatpush3.msra.mxu0 %v464_v25  ;;  %v508_v40 = vld [vmem:[#allocation3 + $0x1b0] sm:$0xff]  ;;  %v507_v44 = vld [vmem:[#allocation3 + $0x1a8] sm:$0xff]  ;;  %v506_v48 = vld [vmem:[#allocation3 + $0x1a0] sm:$0xff] }
  0xae   : > { %1682 = vmatpush3.msra.mxu1 %v496_v26  ;;  %1603 = vmatprep.subr.mxu0 %v479_v27  ;;  %v460_v41 = vld [vmem:[#allocation3 + $0x30] sm:$0xff]  ;;  %v459_v45 = vld [vmem:[#allocation3 + $0x28] sm:$0xff]  ;;  %v458_v49 = vld [vmem:[#allocation3 + $0x20] sm:$0xff] }
  0xaf   : > { %1683 = vmatprep.subr.mxu1 %v511_v28  ;;  %1604 = vmatpush3.msra.mxu0 %v463_v29  ;;  %v492_v42 = vld [vmem:[#allocation3 + $0x130] sm:$0xff]  ;;  %v491_v46 = vld [vmem:[#allocation3 + $0x128] sm:$0xff]  ;;  %v490_v50 = vld [vmem:[#allocation3 + $0x120] sm:$0xff] }
  0xb0   : > { %1684 = vmatpush3.msra.mxu1 %v495_v30  ;;  %1605 = vmatprep.subr.mxu0 %v478_v31  ;;  %v473_v51 = vld [vmem:[#allocation3 + $0x98] sm:$0xff]  ;;  %v252_v53 = vld [vmem:[#allocation2] sm:$0xff]  ;;  %v254_v63 = vld [vmem:[#allocation2 + $0x10] sm:$0x3] }
  0xb1   : > { %1685 = vmatprep.subr.mxu1 %v510_v32  ;;  %1606 = vmatpush3.msra.mxu0 %v462_v33  ;;  %v505_v52 = vld [vmem:[#allocation3 + $0x198] sm:$0xff]  ;;  %v472_v57 = vld [vmem:[#allocation3 + $0x90] sm:$0xff]  ;;  %v307_v61 = vrot.slane %v252_v53, 1  ;;  %v471_v0 = vld [vmem:[#allocation3 + $0x88] sm:$0xff]  ;;  %v364_v4 = vrot.slane %v252_v53, 2  ;;  %v310_v8 = vrot.slane %v254_v63, 1 }
  0xb2   : > { %1686 = vmatpush3.msra.mxu1 %v494_v34  ;;  %1607 = vmatprep.subr.mxu0 %v477_v35  ;;  %v2562_v54 = vld [vmem:[#allocation2 + $0x8] sm:$0xff]  ;;  %v504_v58 = vld [vmem:[#allocation3 + $0x190] sm:$0xff]  ;;  %v503_v1 = vld [vmem:[#allocation3 + $0x188] sm:$0xff]  ;;  %v367_v15 = vrot.slane %v254_v63, 2 }
  0xb3   : > { %1687 = vmatprep.subr.mxu1 %v509_v36  ;;  %1608 = vmatpush3.msra.mxu0 %v461_v37  ;;  %v457_v55 = vld [vmem:[#allocation3 + $0x18] sm:$0xff]  ;;  %v456_v59 = vld [vmem:[#allocation3 + $0x10] sm:$0xff]  ;;  %v308_v62 = vrot.slane %v2562_v54, 1  ;;  %v455_v2 = vld [vmem:[#allocation3 + $0x8] sm:$0xff]  ;;  %v365_v5 = vrot.slane %v2562_v54, 2 }
  0xb4   : > { %1688 = vmatpush3.msra.mxu1 %v493_v38  ;;  %1609 = vmatprep.subr.mxu0 %v476_v39  ;;  %v489_v56 = vld [vmem:[#allocation3 + $0x118] sm:$0xff]  ;;  %v488_v60 = vld [vmem:[#allocation3 + $0x110] sm:$0xff]  ;;  %v487_v3 = vld [vmem:[#allocation3 + $0x108] sm:$0xff] }
  0xb5   : > { %1689 = vmatprep.subr.mxu1 %v508_v40  ;;  %1610 = vmatpush3.msra.mxu0 %v460_v41  ;;  %v470_v6 = vld [vmem:[#allocation3 + $0x80] sm:$0xff]  ;;  %v309_v10 = vsel %vm306_vm0, %v307_v61, %v308_v62  ;;  %v2567_v11 = vld [vmem:[#allocation2 + $0x20] sm:$0xff]  ;;  %v255_v13 = vld [vmem:[#allocation2 + $0x18] sm:$0xff]  ;;  %v366_v14 = vsel %vm363_vm1, %v364_v4, %v365_v5  ;;  %v311_v17 = vsel %vm306_vm0, %v308_v62, %v310_v8 }
  0xb6   : > { %1690 = vmatpush3.msra.mxu1 %v492_v42  ;;  %1611 = vmatprep.subr.mxu0 %v475_v43  ;;  %v502_v7 = vld [vmem:[#allocation3 + $0x180] sm:$0xff]  ;;  %v549_v16 = vld [vmem:[#allocation3 + $0x2f8] sm:$0xff]  ;;  %v312_v18 = vrot.slane %v255_v13, 1  ;;  %v313_v19 = vrot.slane %v2567_v11, 1  ;;  %v548_v22 = vld [vmem:[#allocation3 + $0x2f0] sm:$0xff]  ;;  %v368_v24 = vsel %vm363_vm1, %v365_v5, %v367_v15  ;;  %v369_v25 = vrot.slane %v255_v13, 2 }
  0xb7   : > { %1691 = vmatprep.subr.mxu1 %v507_v44  ;;  %1612 = vmatpush3.msra.mxu0 %v459_v45  ;;  %v454_v9 = vld [vmem:[#allocation3] sm:$0xff]  ;;  %v533_v20 = vld [vmem:[#allocation3 + $0x278] sm:$0xff]  ;;  %v370_v26 = vrot.slane %v2567_v11, 2  ;;  %v532_v27 = vld [vmem:[#allocation3 + $0x270] sm:$0xff] }
  0xb8   : > { %1692 = vmatpush3.msra.mxu1 %v491_v46  ;;  %1613 = vmatprep.subr.mxu0 %v474_v47  ;;  %v486_v12 = vld [vmem:[#allocation3 + $0x100] sm:$0xff]  ;;  %v257_v21 = vld [vmem:[#allocation2 + $0x28] sm:$0x3]  ;;  %v2576_v28 = vsel %vm306_vm0, %v312_v18, %v313_v19  ;;  %v547_v31 = vld [vmem:[#allocation3 + $0x2e8] sm:$0xff] }
  0xb9   : > { %1693 = vmatprep.subr.mxu1 %v506_v48  ;;  %1614 = vmatpush3.msra.mxu0 %v458_v49  ;;  %v581_v23 = vld [vmem:[#allocation3 + $0x3f8] sm:$0xff]  ;;  %v315_v29 = vrot.slane %v257_v21, 1  ;;  %v2578_v30 = vld [vmem:[#allocation2 + $0x30] sm:$0xff]  ;;  %v2580_v32 = vld [vmem:[#allocation2 + $0x38] sm:$0xff]  ;;  %v2585_v35 = vsel %vm363_vm1, %v369_v25, %v370_v26  ;;  %v372_v36 = vrot.slane %v257_v21, 2 }
  0xba   : > { %1694 = vmatpush3.msra.mxu1 %v490_v50  ;;  %1615 = vmatprep.subr.mxu0 %v473_v51  ;;  %v531_v33 = vld [vmem:[#allocation3 + $0x268] sm:$0xff]  ;;  %v565_v34 = vld [vmem:[#allocation3 + $0x378] sm:$0xff]  ;;  %v317_v38 = vrot.slane %v2578_v30, 1  ;;  %v318_v39 = vrot.slane %v2580_v32, 1  ;;  %v546_v40 = vld [vmem:[#allocation3 + $0x2e0] sm:$0xff]  ;;  %v374_v46 = vrot.slane %v2578_v30, 2 }
  0xbb   : > { %1695 = vmatprep.subr.mxu1 %v505_v52  ;;  %1616 = vmatpush3.msra.mxu0 %v457_v55  ;;  %v2589_v37 = vsel %vm306_vm0, %v313_v19, %v315_v29  ;;  %v260_v41 = vld [vmem:[#allocation2 + $0x40] sm:$0x3]  ;;  %v530_v43 = vld [vmem:[#allocation3 + $0x260] sm:$0xff]  ;;  %v2597_v45 = vsel %vm363_vm1, %v370_v26, %v372_v36  ;;  %v375_v47 = vrot.slane %v2580_v32, 2  ;;  %v2604_v49 = vld [vmem:[#allocation2 + $0x48] sm:$0xff] }
  0xbc   : > { %1696 = vmatpush3.msra.mxu1 %v489_v56  ;;  %1617 = vmatprep.subr.mxu0 %v472_v57  ;;  %v580_v42 = vld [vmem:[#allocation3 + $0x3f0] sm:$0xff]  ;;  %v2602_v48 = vsel %vm306_vm0, %v317_v38, %v318_v39  ;;  %v320_v50 = vrot.slane %v260_v41, 1  ;;  %v545_v51 = vld [vmem:[#allocation3 + $0x2d8] sm:$0xff]  ;;  %v2606_v52 = vld [vmem:[#allocation2 + $0x50] sm:$0xff]  ;;  %v377_v57 = vrot.slane %v260_v41, 2 }
  0xbd   : > { %1697 = vmatprep.subr.mxu1 %v504_v58  ;;  %1618 = vmatpush3.msra.mxu0 %v456_v59  ;;  %v564_v44 = vld [vmem:[#allocation3 + $0x370] sm:$0xff]  ;;  %v563_v55 = vld [vmem:[#allocation3 + $0x368] sm:$0xff]  ;;  %v2613_v56 = vsel %vm363_vm1, %v374_v46, %v375_v47  ;;  %v322_v59 = vrot.slane %v2604_v49, 1  ;;  %v578_v63 = vld [vmem:[#allocation3 + $0x3e0] sm:$0xff]  ;;  %v380_v4 = vrot.slane %v2606_v52, 2 }
  0xbe   : > { %1698 = vmatpush3.msra.mxu1 %v488_v60  ;;  %1619 = vmatprep.subr.mxu0 %v471_v0  ;;  %v2616_v58 = vsel %vm306_vm0, %v318_v39, %v320_v50  ;;  %v323_v60 = vrot.slane %v2606_v52, 1  ;;  %v544_v61 = vld [vmem:[#allocation3 + $0x2d0] sm:$0xff]  ;;  %v263_v62 = vld [vmem:[#allocation2 + $0x58] sm:$0x3]  ;;  %v542_v18 = vld [vmem:[#allocation3 + $0x2c0] sm:$0xff] }
  0xbf   : > { %1699 = vmatprep.subr.mxu1 %v503_v1  ;;  %1620 = vmatpush3.msra.mxu0 %v455_v2  ;;  %v528_v0 = vld [vmem:[#allocation3 + $0x250] sm:$0xff]  ;;  %v562_v1 = vld [vmem:[#allocation3 + $0x360] sm:$0xff]  ;;  %v2625_v2 = vsel %vm363_vm1, %v375_v47, %v377_v57  ;;  %v543_v8 = vld [vmem:[#allocation3 + $0x2c8] sm:$0xff] }
  0xc0   : > { %1700 = vmatpush3.msra.mxu1 %v487_v3  ;;  %1621 = vmatprep.subr.mxu0 %v470_v6  ;;  %v379_v3 = vrot.slane %v2604_v49, 2  ;;  %v2630_v5 = vsel %vm306_vm0, %v322_v59, %v323_v60  ;;  %v2632_v6 = vld [vmem:[#allocation2 + $0x60] sm:$0xff]  ;;  %v266_v19 = vld [vmem:[#allocation2 + $0x70] sm:$0x3]  ;;  %v525_v36 = vld [vmem:[#allocation3 + $0x238] sm:$0xff] }
  0xc1   : > { %1701 = vmatprep.subr.mxu1 %v502_v7  ;;  %1622 = vmatpush3.msra.mxu0 %v454_v9  ;;  %v325_v7 = vrot.slane %v263_v62, 1  ;;  %v2634_v9 = vld [vmem:[#allocation2 + $0x68] sm:$0xff]  ;;  %v526_v21 = vld [vmem:[#allocation3 + $0x240] sm:$0xff]  ;;  %v330_v29 = vrot.slane %v266_v19, 1  ;;  %v559_v38 = vld [vmem:[#allocation3 + $0x348] sm:$0xff] }
  0xc2   : > { %662 = vmatprep.mubr.f32.mxu0 %v309_v10  ;;  %1702 = vmatpush3.msra.mxu1 %v486_v12  ;;  %v577_v10 = vld [vmem:[#allocation3 + $0x3d8] sm:$0xff]  ;;  %v385_v25 = vrot.slane %v2634_v9, 2  ;;  %v574_v47 = vld [vmem:[#allocation3 + $0x3c0] sm:$0xff]  ;;  %v524_v50 = vld [vmem:[#allocation3 + $0x230] sm:$0xff] }
  0xc3   : > { %807 = vmatprep.mubr.f32.mxu1 %v255_v13  ;;  %663 = vmatmul.mubr.f32.vlgmr.msra.gmra.mxu0 %v252_v53  ;;  %v579_v53 = vld [vmem:[#allocation3 + $0x3e8] sm:$0xff]  ;;  %v561_v12 = vld [vmem:[#allocation3 + $0x358] sm:$0xff]  ;;  %v2644_v15 = vsel %vm306_vm0, %v323_v60, %v325_v7  ;;  %v2688_v59 = vld [vmem:[#allocation2 + $0x90] sm:$0xff] }
  0xc4   : > { %808 = vmatmul.mubr.f32.vlgmr.msra.gmra.mxu1 %v366_v14  ;;  %1751 = vmatprep.subr.mxu0 %v549_v16  ;;  %v382_v14 = vrot.slane %v263_v62, 2  ;;  %v327_v16 = vrot.slane %v2632_v6, 1  ;;  %v269_v46 = vld [vmem:[#allocation2 + $0x88] sm:$0x3]  ;;  %v2690_v62 = vld [vmem:[#allocation2 + $0x98] sm:$0xff] }
  0xc5   : > { %667 = vmatprep.mubr.f32.mxu0 %v311_v17  ;;  %1752 = vmatpush3.msra.mxu0 %v533_v20  ;;  %v328_v17 = vrot.slane %v2634_v9, 1  ;;  %v576_v20 = vld [vmem:[#allocation3 + $0x3d0] sm:$0xff]  ;;  %v335_v60 = vrot.slane %v269_v46, 1 }
  0xc6   : > { %812 = vmatprep.mubr.f32.mxu1 %v2567_v11  ;;  %1753 = vmatprep.subr.mxu0 %v548_v22  ;;  %v560_v22 = vld [vmem:[#allocation3 + $0x350] sm:$0xff] }
  0xc7   : > { %1831 = vmatprep.subr.mxu1 %v581_v23  ;;  %668 = vmatmul.mubr.f32.gmra.mxu0 %v2562_v54  ;;  %v529_v54 = vld [vmem:[#allocation3 + $0x258] sm:$0xff]  ;;  %v2653_v23 = vsel %vm363_vm1, %v380_v4, %v382_v14  ;;  %v2658_v26 = vsel %vm306_vm0, %v327_v16, %v328_v17  ;;  %v2672_v41 = vsel %vm306_vm0, %v328_v17, %v330_v29  ;;  %v272_v14 = vld [vmem:[#allocation2 + $0xa0] sm:$0x3]  ;;  %v522_v16 = vld [vmem:[#allocation3 + $0x220] sm:$0xff] }
  0xc8   : > { %813 = vmatmul.mubr.f32.gmra.mxu1 %v368_v24  ;;  %1754 = vmatpush3.msra.mxu0 %v532_v27  ;;  %v384_v24 = vrot.slane %v2632_v6, 2  ;;  %v2660_v27 = vld [vmem:[#allocation2 + $0x78] sm:$0xff]  ;;  %v556_v17 = vld [vmem:[#allocation3 + $0x330] sm:$0xff]  ;;  %v2718_v29 = vld [vmem:[#allocation2 + $0xb0] sm:$0xff] }
  0xc9   : > { %672 = vmatprep.mubr.f32.mxu0 %v2576_v28  ;;  %817 = vmatprep.mubr.f32.mxu1 %v2578_v30 }
  0xca   : > { %1755 = vmatprep.subr.mxu0 %v547_v31  ;;  %1832 = vmatpush3.msra.mxu1 %v565_v34  ;;  %v541_v31 = vld [vmem:[#allocation3 + $0x2b8] sm:$0xff]  ;;  %v575_v34 = vld [vmem:[#allocation3 + $0x3c8] sm:$0xff]  ;;  %v2669_v39 = vsel %vm363_vm1, %v384_v24, %v385_v25  ;;  %v340_v24 = vrot.slane %v272_v14, 1 }
  0xcb   : > { %1756 = vmatpush3.msra.mxu0 %v531_v33  ;;  %1833 = vmatprep.subr.mxu1 %v580_v42  ;;  %v2662_v33 = vld [vmem:[#allocation2 + $0x80] sm:$0xff]  ;;  %v332_v42 = vrot.slane %v2660_v27, 1 }
  0xcc   : > { %673 = vmatmul.mubr.f32.gmra.mxu0 %v255_v13  ;;  %818 = vmatmul.mubr.f32.gmra.mxu1 %v2585_v35  ;;  %v2641_v13 = vsel %vm363_vm1, %v379_v3, %v380_v4  ;;  %v392_v4 = vrot.slane %v269_v46, 2  ;;  %v536_v46 = vld [vmem:[#allocation3 + $0x290] sm:$0xff] }
  0xcd   : > { %677 = vmatprep.mubr.f32.mxu0 %v2589_v37  ;;  %822 = vmatprep.mubr.f32.mxu1 %v2580_v32 }
  0xce   : > { %1757 = vmatprep.subr.mxu0 %v546_v40  ;;  %1834 = vmatpush3.msra.mxu1 %v564_v44  ;;  %v387_v40 = vrot.slane %v266_v19, 2  ;;  %v540_v44 = vld [vmem:[#allocation3 + $0x2b0] sm:$0xff]  ;;  %v394_v19 = vrot.slane %v2688_v59, 2 }
  0xcf   : > { %1758 = vmatpush3.msra.mxu0 %v530_v43  ;;  %1835 = vmatprep.subr.mxu1 %v579_v53  ;;  %v333_v43 = vrot.slane %v2662_v33, 1 }
  0xd0   : > { %678 = vmatmul.mubr.f32.gmra.mxu0 %v2567_v11  ;;  %823 = vmatmul.mubr.f32.gmra.mxu1 %v2597_v45  ;;  %v527_v11 = vld [vmem:[#allocation3 + $0x248] sm:$0xff]  ;;  %v2681_v53 = vsel %vm363_vm1, %v385_v25, %v387_v40  ;;  %v537_v25 = vld [vmem:[#allocation3 + $0x298] sm:$0xff]  ;;  %v397_v40 = vrot.slane %v272_v14, 2 }
  0xd1   : > { %682 = vmatprep.mubr.f32.mxu0 %v2602_v48  ;;  %827 = vmatprep.mubr.f32.mxu1 %v2604_v49  ;;  %v2686_v57 = vsel %vm306_vm0, %v332_v42, %v333_v43  ;;  %v2700_v7 = vsel %vm306_vm0, %v333_v43, %v335_v60 }
  0xd2   : > { %1759 = vmatprep.subr.mxu0 %v545_v51  ;;  %1836 = vmatpush3.msra.mxu1 %v563_v55  ;;  %v558_v51 = vld [vmem:[#allocation3 + $0x340] sm:$0xff]  ;;  %v390_v55 = vrot.slane %v2662_v33, 2 }
  0xd3   : > { %1760 = vmatpush3.msra.mxu0 %v529_v54  ;;  %1837 = vmatprep.subr.mxu1 %v578_v63  ;;  %v389_v54 = vrot.slane %v2660_v27, 2  ;;  %v573_v63 = vld [vmem:[#allocation3 + $0x3b8] sm:$0xff] }
  0xd4   : > { %683 = vmatmul.mubr.f32.gmra.mxu0 %v2578_v30  ;;  %828 = vmatmul.mubr.f32.gmra.mxu1 %v2613_v56 }
  0xd5   : > { %687 = vmatprep.mubr.f32.mxu0 %v2616_v58  ;;  %832 = vmatprep.mubr.f32.mxu1 %v2606_v52  ;;  %v2697_v3 = vsel %vm363_vm1, %v389_v54, %v390_v55  ;;  %v554_v54 = vld [vmem:[#allocation3 + $0x320] sm:$0xff] }
  0xd6   : > { %1761 = vmatprep.subr.mxu0 %v544_v61  ;;  %1838 = vmatpush3.msra.mxu1 %v562_v1  ;;  %v539_v61 = vld [vmem:[#allocation3 + $0x2a8] sm:$0xff]  ;;  %v557_v1 = vld [vmem:[#allocation3 + $0x338] sm:$0xff] }
  0xd7   : > { %1762 = vmatpush3.msra.mxu0 %v528_v0  ;;  %1839 = vmatprep.subr.mxu1 %v577_v10  ;;  %v523_v0 = vld [vmem:[#allocation3 + $0x228] sm:$0xff]  ;;  %v338_v10 = vrot.slane %v2690_v62, 1 }
  0xd8   : > { %688 = vmatmul.mubr.f32.gmra.mxu0 %v2580_v32  ;;  %833 = vmatmul.mubr.f32.gmra.mxu1 %v2625_v2 }
  0xd9   : > { %692 = vmatprep.mubr.f32.mxu0 %v2630_v5  ;;  %837 = vmatprep.mubr.f32.mxu1 %v2632_v6  ;;  %v2728_v42 = vsel %vm306_vm0, %v338_v10, %v340_v24  ;;  %v534_v24 = vld [vmem:[#allocation3 + $0x280] sm:$0xff] }
  0xda   : > { %1763 = vmatprep.subr.mxu0 %v543_v8  ;;  %1840 = vmatpush3.msra.mxu1 %v561_v12  ;;  %v337_v8 = vrot.slane %v2688_v59, 1  ;;  %v572_v12 = vld [vmem:[#allocation3 + $0x3b0] sm:$0xff] }
  0xdb   : > { %1764 = vmatpush3.msra.mxu0 %v527_v11  ;;  %1841 = vmatprep.subr.mxu1 %v576_v20  ;;  %v538_v11 = vld [vmem:[#allocation3 + $0x2a0] sm:$0xff]  ;;  %v395_v20 = vrot.slane %v2690_v62, 2 }
  0xdc   : > { %693 = vmatmul.mubr.f32.gmra.mxu0 %v2604_v49  ;;  %838 = vmatmul.mubr.f32.gmra.mxu1 %v2641_v13 }
  0xdd   : > { %697 = vmatprep.mubr.f32.mxu0 %v2644_v15  ;;  %842 = vmatprep.mubr.f32.mxu1 %v2634_v9 }
  0xde   : > { %1765 = vmatprep.subr.mxu0 %v542_v18  ;;  %1842 = vmatpush3.msra.mxu1 %v560_v22  ;;  %v2709_v18 = vsel %vm363_vm1, %v390_v55, %v392_v4  ;;  %v2716_v22 = vld [vmem:[#allocation2 + $0xa8] sm:$0xff]  ;;  %v2737_v55 = vsel %vm363_vm1, %v395_v20, %v397_v40  ;;  %v535_v4 = vld [vmem:[#allocation3 + $0x288] sm:$0xff]  ;;  %v566_v40 = vld [vmem:[#allocation3 + $0x380] sm:$0xff] }
  0xdf   : > { %1766 = vmatpush3.msra.mxu0 %v526_v21  ;;  %1843 = vmatprep.subr.mxu1 %v575_v34  ;;  %v2714_v21 = vsel %vm306_vm0, %v337_v8, %v338_v10  ;;  %v521_v34 = vld [vmem:[#allocation3 + $0x218] sm:$0xff]  ;;  %v342_v43 = vrot.slane %v2716_v22, 1  ;;  %v399_v60 = vrot.slane %v2716_v22, 2  ;;  %v519_v10 = vld [vmem:[#allocation3 + $0x208] sm:$0xff] }
  0xe0   : > { %698 = vmatmul.mubr.f32.gmra.mxu0 %v2606_v52  ;;  %843 = vmatmul.mubr.f32.gmra.mxu1 %v2653_v23  ;;  %v569_v8 = vld [vmem:[#allocation3 + $0x398] sm:$0xff] }
  0xe1   : > { %702 = vmatprep.mubr.f32.mxu0 %v2658_v26  ;;  %847 = vmatprep.mubr.f32.mxu1 %v2660_v27 }
  0xe2   : > { %1767 = vmatprep.subr.mxu0 %v541_v31  ;;  %1844 = vmatpush3.msra.mxu1 %v559_v38  ;;  %v571_v31 = vld [vmem:[#allocation3 + $0x3a8] sm:$0xff]  ;;  %v2725_v38 = vsel %vm363_vm1, %v394_v19, %v395_v20  ;;  %v2756_v19 = vld [vmem:[#allocation2 + $0xc8] sm:$0xff]  ;;  %v552_v20 = vld [vmem:[#allocation3 + $0x310] sm:$0xff] }
  0xe3   : > { %1768 = vmatpush3.msra.mxu0 %v525_v36  ;;  %1845 = vmatprep.subr.mxu1 %v574_v47  ;;  %v555_v36 = vld [vmem:[#allocation3 + $0x328] sm:$0xff]  ;;  %v570_v47 = vld [vmem:[#allocation3 + $0x3a0] sm:$0xff] }
  0xe4   : > { %703 = vmatmul.mubr.f32.gmra.mxu0 %v2632_v6  ;;  %848 = vmatmul.mubr.f32.gmra.mxu1 %v2669_v39 }
  0xe5   : > { %707 = vmatprep.mubr.f32.mxu0 %v2672_v41  ;;  %852 = vmatprep.mubr.f32.mxu1 %v2662_v33 }
  0xe6   : > { %1769 = vmatprep.subr.mxu0 %v540_v44  ;;  %1846 = vmatpush3.msra.mxu1 %v558_v51  ;;  %v343_v44 = vrot.slane %v2718_v29, 1  ;;  %v520_v51 = vld [vmem:[#allocation3 + $0x210] sm:$0xff] }
  0xe7   : > { %1770 = vmatpush3.msra.mxu0 %v524_v50  ;;  %1847 = vmatprep.subr.mxu1 %v573_v63  ;;  %v275_v50 = vld [vmem:[#allocation2 + $0xb8] sm:$0x3] }
  0xe8   : > { %708 = vmatmul.mubr.f32.gmra.mxu0 %v2634_v9  ;;  %853 = vmatmul.mubr.f32.gmra.mxu1 %v2681_v53  ;;  %v2742_v63 = vsel %vm306_vm0, %v342_v43, %v343_v44  ;;  %v402_v14 = vrot.slane %v275_v50, 2  ;;  %v550_v43 = vld [vmem:[#allocation3 + $0x300] sm:$0xff] }
  0xe9   : > { %712 = vmatprep.mubr.f32.mxu0 %v2686_v57  ;;  %857 = vmatprep.mubr.f32.mxu1 %v2688_v59 }
  0xea   : > { %1771 = vmatprep.subr.mxu0 %v539_v61  ;;  %1848 = vmatpush3.msra.mxu1 %v557_v1  ;;  %v400_v61 = vrot.slane %v2718_v29, 2  ;;  %v345_v1 = vrot.slane %v275_v50, 1 }
  0xeb   : > { %1772 = vmatpush3.msra.mxu0 %v523_v0  ;;  %1849 = vmatprep.subr.mxu1 %v572_v12  ;;  %v2744_v0 = vld [vmem:[#allocation2 + $0xc0] sm:$0xff] }
  0xec   : > { %713 = vmatmul.mubr.f32.gmra.mxu0 %v2660_v27  ;;  %858 = vmatmul.mubr.f32.gmra.mxu1 %v2697_v3  ;;  %v2751_v12 = vsel %vm363_vm1, %v399_v60, %v400_v61 }
  0xed   : > { %717 = vmatprep.mubr.f32.mxu0 %v2700_v7  ;;  %862 = vmatprep.mubr.f32.mxu1 %v2690_v62 }
  0xee   : > { %1773 = vmatprep.subr.mxu0 %v538_v11  ;;  %1850 = vmatpush3.msra.mxu1 %v556_v17  ;;  %v553_v11 = vld [vmem:[#allocation3 + $0x318] sm:$0xff]  ;;  %v2754_v17 = vsel %vm306_vm0, %v343_v44, %v345_v1 }
  0xef   : > { %1774 = vmatpush3.msra.mxu0 %v522_v16  ;;  %1851 = vmatprep.subr.mxu1 %v571_v31  ;;  %v568_v16 = vld [vmem:[#allocation3 + $0x390] sm:$0xff]  ;;  %v2762_v31 = vsel %vm363_vm1, %v400_v61, %v402_v14  ;;  %v597_v44 = vld [vmem:[#allocation3 + $0x478] sm:$0xff] }
  0xf0   : > { %718 = vmatmul.mubr.f32.gmra.mxu0 %v2662_v33  ;;  %863 = vmatmul.mubr.f32.gmra.mxu1 %v2709_v18 }
  0xf1   : > { %722 = vmatprep.mubr.f32.mxu0 %v2714_v21  ;;  %867 = vmatprep.mubr.f32.mxu1 %v2716_v22 }
  0xf2   : > { %1775 = vmatprep.subr.mxu0 %v537_v25  ;;  %1852 = vmatpush3.msra.mxu1 %v555_v36  ;;  %v567_v25 = vld [vmem:[#allocation3 + $0x388] sm:$0xff] }
  0xf3   : > { %1776 = vmatpush3.msra.mxu0 %v521_v34  ;;  %1853 = vmatprep.subr.mxu1 %v570_v47  ;;  %v518_v34 = vld [vmem:[#allocation3 + $0x200] sm:$0xff]  ;;  %v551_v36 = vld [vmem:[#allocation3 + $0x308] sm:$0xff] }
  0xf4   : > { %723 = vmatmul.mubr.f32.gmra.mxu0 %v2688_v59  ;;  %868 = vmatmul.mubr.f32.gmra.mxu1 %v2725_v38  ;;  %v595_v47 = vld [vmem:[#allocation3 + $0x468] sm:$0xff] }
  0xf5   : > { %727 = vmatprep.mubr.f32.mxu0 %v2728_v42  ;;  %872 = vmatprep.mubr.f32.mxu1 %v2718_v29 }
  0xf6   : > { %1777 = vmatprep.subr.mxu0 %v536_v46  ;;  %1854 = vmatpush3.msra.mxu1 %v554_v54  ;;  %v596_v46 = vld [vmem:[#allocation3 + $0x470] sm:$0xff] }
  0xf7   : > { %1778 = vmatpush3.msra.mxu0 %v520_v51  ;;  %1855 = vmatprep.subr.mxu1 %v569_v8  ;;  %v583_v51 = vld [vmem:[#allocation3 + $0x408] sm:$0xff] }
  0xf8   : > { %728 = vmatmul.mubr.f32.gmra.mxu0 %v2690_v62  ;;  %873 = vmatmul.mubr.f32.gmra.mxu1 %v2737_v55 }
  0xf9   : > { %732 = vmatprep.mubr.f32.mxu0 %v2742_v63  ;;  %877 = vmatprep.mubr.f32.mxu1 %v2744_v0 }
  0xfa   : > { %1779 = vmatprep.subr.mxu0 %v535_v4  ;;  %1856 = vmatpush3.msra.mxu1 %v553_v11 }
  0xfb   : > { %1780 = vmatpush3.msra.mxu0 %v519_v10  ;;  %1857 = vmatprep.subr.mxu1 %v568_v16 }
  0xfc   : > { %733 = vmatmul.mubr.f32.gmra.mxu0 %v2716_v22  ;;  %878 = vmatmul.mubr.f32.gmra.mxu1 %v2751_v12 }
  0xfd   : > { %737 = vmatprep.mubr.f32.mxu0 %v2754_v17  ;;  %882 = vmatprep.mubr.f32.mxu1 %v2756_v19 }
  0xfe   : > { %1858 = vmatpush3.msra.mxu1 %v552_v20  ;;  %1781 = vmatprep.subr.mxu0 %v534_v24 }
  0xff   : > { %1859 = vmatprep.subr.mxu1 %v567_v25  ;;  %1782 = vmatpush3.msra.mxu0 %v518_v34 }
 0x100   : > { %738 = vmatmul.mubr.f32.gmra.mxu0 %v2718_v29  ;;  %883 = vmatmul.mubr.f32.gmra.mxu1 %v2762_v31 }
 0x101   : > { %1860 = vmatpush3.msra.mxu1 %v551_v36  ;;  %952 = vmatprep.mubr.f32.mxu0 %v2585_v35  ;;  %v591_v35 = vld [vmem:[#allocation3 + $0x448] sm:$0xff] }
 0x102   : > { %1861 = vmatprep.subr.mxu1 %v566_v40  ;;  %1097 = vmatprep.mubr.f32.mxu1 %v2602_v48 }
 0x103   : > { %1862 = vmatpush3.msra.mxu1 %v550_v43  ;;  %1943 = vmatprep.subr.mxu0 %v597_v44 }
 0x104   : > { %953 = vmatmul.mubr.f32.vlgmr.msra.gmra.mxu0 %v2576_v28  ;;  %1098 = vmatmul.mubr.f32.vlgmr.msra.gmra.mxu1 %v2578_v30  ;;  %v594_v28 = vld [vmem:[#allocation3 + $0x460] sm:$0xff]  ;;  %v593_v30 = vld [vmem:[#allocation3 + $0x458] sm:$0xff] }
 0x105   : > { %957 = vmatprep.mubr.f32.mxu0 %v2597_v45  ;;  %1944 = vmatpush3.msra.mxu0 %v597_v44  ;;  %v589_v45 = vld [vmem:[#allocation3 + $0x438] sm:$0xff] }
 0x106   : > { %1102 = vmatprep.mubr.f32.mxu1 %v2616_v58  ;;  %1945 = vmatprep.subr.mxu0 %v596_v46 }
 0x107   : > { %1999 = vmatprep.subr.mxu1 %v597_v44  ;;  %1946 = vmatpush3.msra.mxu0 %v596_v46 }
 0x108   : > { %958 = vmatmul.mubr.f32.gmra.mxu0 %v2589_v37  ;;  %1103 = vmatmul.mubr.f32.gmra.mxu1 %v2580_v32  ;;  %v592_v32 = vld [vmem:[#allocation3 + $0x450] sm:$0xff]  ;;  %v590_v37 = vld [vmem:[#allocation3 + $0x440] sm:$0xff] }
 0x109   : > { %962 = vmatprep.mubr.f32.mxu0 %v2613_v56  ;;  %1107 = vmatprep.mubr.f32.mxu1 %v2630_v5 }
 0x10a   : > { %1947 = vmatprep.subr.mxu0 %v595_v47  ;;  %2015 = vmatpush3.msra.mxu1 %v597_v44 }
 0x10b   : > { %1948 = vmatpush3.msra.mxu0 %v595_v47  ;;  %2000 = vmatprep.subr.mxu1 %v596_v46 }
 0x10c   : > { %963 = vmatmul.mubr.f32.gmra.mxu0 %v2602_v48  ;;  %1108 = vmatmul.mubr.f32.gmra.mxu1 %v2604_v49  ;;  %v588_v48 = vld [vmem:[#allocation3 + $0x430] sm:$0xff]  ;;  %v587_v49 = vld [vmem:[#allocation3 + $0x428] sm:$0xff] }
 0x10d   : > { %967 = vmatprep.mubr.f32.mxu0 %v2625_v2  ;;  %1112 = vmatprep.mubr.f32.mxu1 %v2644_v15 }
 0x10e   : > { %1949 = vmatprep.subr.mxu0 %v594_v28  ;;  %2016 = vmatpush3.msra.mxu1 %v596_v46 }
 0x10f   : > { %1950 = vmatpush3.msra.mxu0 %v594_v28  ;;  %2001 = vmatprep.subr.mxu1 %v595_v47 }
 0x110   : > { %968 = vmatmul.mubr.f32.gmra.mxu0 %v2616_v58  ;;  %1113 = vmatmul.mubr.f32.gmra.mxu1 %v2606_v52  ;;  %v423_v52 = vrot.slane %v2744_v0, 1  ;;  %v424_v58 = vrot.slane %v2756_v19, 1 }
 0x111   : > { %972 = vmatprep.mubr.f32.mxu0 %v2641_v13  ;;  %1117 = vmatprep.mubr.f32.mxu1 %v2658_v26 }
 0x112   : > { %1951 = vmatprep.subr.mxu0 %v593_v30  ;;  %2017 = vmatpush3.msra.mxu1 %v595_v47 }
 0x113   : > { %1952 = vmatpush3.msra.mxu0 %v593_v30  ;;  %2002 = vmatprep.subr.mxu1 %v594_v28 }
 0x114   : > { %973 = vmatmul.mubr.f32.gmra.mxu0 %v2630_v5  ;;  %1118 = vmatmul.mubr.f32.gmra.mxu1 %v2632_v6  ;;  %v586_v5 = vld [vmem:[#allocation3 + $0x420] sm:$0xff] }
 0x115   : > { %977 = vmatprep.mubr.f32.mxu0 %v2653_v23  ;;  %1122 = vmatprep.mubr.f32.mxu1 %v2672_v41  ;;  %v278_v6 = vld [vmem:[#allocation2 + $0xd0] sm:$0x3] }
 0x116   : > { %1953 = vmatprep.subr.mxu0 %v592_v32  ;;  %2018 = vmatpush3.msra.mxu1 %v594_v28  ;;  %v433_v50 = vrot.slane %v278_v6, 2 }
 0x117   : > { %1954 = vmatpush3.msra.mxu0 %v592_v32  ;;  %2003 = vmatprep.subr.mxu1 %v593_v30 }
 0x118   : > { %978 = vmatmul.mubr.f32.gmra.mxu0 %v2644_v15  ;;  %1123 = vmatmul.mubr.f32.gmra.mxu1 %v2634_v9  ;;  %v425_v9 = vsel %vm306_vm0, %v423_v52, %v424_v58  ;;  %v426_v15 = vrot.slane %v278_v6, 1 }
 0x119   : > { %982 = vmatprep.mubr.f32.mxu0 %v2669_v39  ;;  %1127 = vmatprep.mubr.f32.mxu1 %v2686_v57 }
 0x11a   : > { %1955 = vmatprep.subr.mxu0 %v591_v35  ;;  %2019 = vmatpush3.msra.mxu1 %v593_v30 }
 0x11b   : > { %1956 = vmatpush3.msra.mxu0 %v591_v35  ;;  %2004 = vmatprep.subr.mxu1 %v592_v32 }
 0x11c   : > { %983 = vmatmul.mubr.f32.gmra.mxu0 %v2658_v26  ;;  %1128 = vmatmul.mubr.f32.gmra.mxu1 %v2660_v27  ;;  %v585_v26 = vld [vmem:[#allocation3 + $0x418] sm:$0xff]  ;;  %v2816_v27 = vld [vmem:[#allocation2 + $0xd8] sm:$0xff] }
 0x11d   : > { %987 = vmatprep.mubr.f32.mxu0 %v2681_v53  ;;  %1132 = vmatprep.mubr.f32.mxu1 %v2700_v7 }
 0x11e   : > { %1957 = vmatprep.subr.mxu0 %v590_v37  ;;  %2020 = vmatpush3.msra.mxu1 %v592_v32 }
 0x11f   : > { %1958 = vmatpush3.msra.mxu0 %v590_v37  ;;  %2005 = vmatprep.subr.mxu1 %v591_v35 }
 0x120   : > { %988 = vmatmul.mubr.f32.gmra.mxu0 %v2672_v41  ;;  %1133 = vmatmul.mubr.f32.gmra.mxu1 %v2662_v33  ;;  %v2818_v33 = vld [vmem:[#allocation2 + $0xe0] sm:$0xff]  ;;  %v430_v41 = vrot.slane %v2744_v0, 2 }
 0x121   : > { %992 = vmatprep.mubr.f32.mxu0 %v2697_v3  ;;  %1137 = vmatprep.mubr.f32.mxu1 %v2714_v21  ;;  %v448_v1 = vrot.slane %v2818_v33, 2 }
 0x122   : > { %1959 = vmatprep.subr.mxu0 %v589_v45  ;;  %2021 = vmatpush3.msra.mxu1 %v591_v35 }
 0x123   : > { %1960 = vmatpush3.msra.mxu0 %v589_v45  ;;  %2006 = vmatprep.subr.mxu1 %v590_v37 }
 0x124   : > { %993 = vmatmul.mubr.f32.gmra.mxu0 %v2686_v57  ;;  %1138 = vmatmul.mubr.f32.gmra.mxu1 %v2688_v59  ;;  %v427_v57 = vsel %vm306_vm0, %v424_v58, %v426_v15  ;;  %v431_v59 = vrot.slane %v2756_v19, 2 }
 0x125   : > { %997 = vmatprep.mubr.f32.mxu0 %v2709_v18  ;;  %1142 = vmatprep.mubr.f32.mxu1 %v2728_v42 }
 0x126   : > { %1961 = vmatprep.subr.mxu0 %v588_v48  ;;  %2022 = vmatpush3.msra.mxu1 %v590_v37  ;;  %v434_v60 = vsel %vm363_vm1, %v431_v59, %v433_v50 }
 0x127   : > { %1962 = vmatpush3.msra.mxu0 %v588_v48  ;;  %2007 = vmatprep.subr.mxu1 %v589_v45 }
 0x128   : > { %998 = vmatmul.mubr.f32.gmra.mxu0 %v2700_v7  ;;  %1143 = vmatmul.mubr.f32.gmra.mxu1 %v2690_v62  ;;  %v440_v62 = vrot.slane %v2816_v27, 1  ;;  %v441_v7 = vrot.slane %v2818_v33, 1 }
 0x129   : > { %1002 = vmatprep.mubr.f32.mxu0 %v2725_v38  ;;  %1147 = vmatprep.mubr.f32.mxu1 %v2742_v63 }
 0x12a   : > { %1963 = vmatprep.subr.mxu0 %v587_v49  ;;  %2023 = vmatpush3.msra.mxu1 %v589_v45 }
 0x12b   : > { %1964 = vmatpush3.msra.mxu0 %v587_v49  ;;  %2008 = vmatprep.subr.mxu1 %v588_v48 }
 0x12c   : > { %1003 = vmatmul.mubr.f32.gmra.mxu0 %v2714_v21  ;;  %1148 = vmatmul.mubr.f32.gmra.mxu1 %v2716_v22  ;;  %v584_v21 = vld [vmem:[#allocation3 + $0x410] sm:$0xff]  ;;  %v281_v22 = vld [vmem:[#allocation2 + $0xe8] sm:$0x3] }
 0x12d   : > { %1007 = vmatprep.mubr.f32.mxu0 %v2737_v55  ;;  %1152 = vmatprep.mubr.f32.mxu1 %v2754_v17  ;;  %v443_v54 = vrot.slane %v281_v22, 1 }
 0x12e   : > { %1965 = vmatprep.subr.mxu0 %v586_v5  ;;  %2024 = vmatpush3.msra.mxu1 %v588_v48 }
 0x12f   : > { %1966 = vmatpush3.msra.mxu0 %v586_v5  ;;  %2009 = vmatprep.subr.mxu1 %v587_v49  ;;  %v444_v61 = vsel %vm306_vm0, %v441_v7, %v443_v54 }
 0x130   : > { %1008 = vmatmul.mubr.f32.gmra.mxu0 %v2728_v42  ;;  %1153 = vmatmul.mubr.f32.gmra.mxu1 %v2718_v29  ;;  %v432_v29 = vsel %vm363_vm1, %v430_v41, %v431_v59  ;;  %v442_v42 = vsel %vm306_vm0, %v440_v62, %v441_v7 }
 0x131   : > { %1012 = vmatprep.mubr.f32.mxu0 %v2751_v12  ;;  %1157 = vmatprep.mubr.f32.mxu1 %v425_v9 }
 0x132   : > { %1967 = vmatprep.subr.mxu0 %v585_v26  ;;  %2025 = vmatpush3.msra.mxu1 %v587_v49 }
 0x133   : > { %1968 = vmatpush3.msra.mxu0 %v585_v26  ;;  %2010 = vmatprep.subr.mxu1 %v586_v5 }
 0x134   : > { %1013 = vmatmul.mubr.f32.gmra.mxu0 %v2742_v63  ;;  %1158 = vmatmul.mubr.f32.gmra.mxu1 %v2744_v0  ;;  %v582_v63 = vld [vmem:[#allocation3 + $0x400] sm:$0xff]  ;;  %v447_v0 = vrot.slane %v2816_v27, 2 }
 0x135   : > { %1017 = vmatprep.mubr.f32.mxu0 %v2762_v31  ;;  %1162 = vmatprep.mubr.f32.mxu1 %v427_v57 }
 0x136   : > { %1969 = vmatprep.subr.mxu0 %v584_v21  ;;  %2026 = vmatpush3.msra.mxu1 %v586_v5 }
 0x137   : > { %1970 = vmatpush3.msra.mxu0 %v584_v21  ;;  %2011 = vmatprep.subr.mxu1 %v585_v26 }
 0x138   : > { %1018 = vmatmul.mubr.f32.gmra.mxu0 %v2754_v17  ;;  %1163 = vmatmul.mubr.f32.gmra.mxu1 %v2756_v19 }
 0x139   : > { %1022 = vmatprep.mubr.f32.mxu0 %v432_v29  ;;  %1167 = vmatprep.mubr.f32.mxu1 %v442_v42 }
 0x13a   : > { %1971 = vmatprep.subr.mxu0 %v583_v51  ;;  %2027 = vmatpush3.msra.mxu1 %v585_v26 }
 0x13b   : > { %1972 = vmatpush3.msra.mxu0 %v583_v51  ;;  %2012 = vmatprep.subr.mxu1 %v584_v21 }
 0x13c   : > { %1023 = vmatmul.mubr.f32.gmra.mxu0 %v425_v9  ;;  %1168 = vmatmul.mubr.f32.gmra.mxu1 %v2816_v27 }
 0x13d   : > { %1027 = vmatprep.mubr.f32.mxu0 %v434_v60  ;;  %1172 = vmatprep.mubr.f32.mxu1 %v444_v61 }
 0x13e   : > { %2028 = vmatpush3.msra.mxu1 %v584_v21  ;;  %1973 = vmatprep.subr.mxu0 %v582_v63 }
 0x13f   : > { %2013 = vmatprep.subr.mxu1 %v583_v51  ;;  %1974 = vmatpush3.msra.mxu0 %v582_v63 }
 0x140   : > { %1028 = vmatmul.mubr.f32.gmra.mxu0 %v427_v57  ;;  %1173 = vmatmul.mubr.f32.gmra.mxu1 %v2818_v33 }
 0x141   : > { %2029 = vmatpush3.msra.mxu1 %v583_v51  ;;  %1975 = vmatprep.mubr.f32.mxu0 %v2613_v56  ;;  %v450_v56 = vrot.slane %v281_v22, 2 }
 0x142   : > { %2014 = vmatprep.subr.mxu1 %v582_v63  ;;  %1987 = vmatprep.mubr.f32.mxu1 %v2725_v38 }
 0x143   : > { %2030 = vmatpush3.msra.mxu1 %v582_v63 }
 0x144   : > { %1976 = vmatmul.mubr.f32.vlgmr.msra.gmra.mxu0 %v2625_v2  ;;  %1988 = vmatmul.mubr.f32.vlgmr.msra.gmra.mxu1 %v2737_v55  ;;  %v449_v2 = vsel %vm363_vm1, %v447_v0, %v448_v1 }
 0x145   : > { %1978 = vmatprep.mubr.f32.mxu0 %v2641_v13  ;;  %1990 = vmatprep.mubr.f32.mxu1 %v2751_v12  ;;  %v451_v13 = vsel %vm363_vm1, %v448_v1, %v450_v56 }
 0x148   : > { %1979 = vmatmul.mubr.f32.gmra.mxu0 %v2653_v23  ;;  %1991 = vmatmul.mubr.f32.gmra.mxu1 %v2762_v31 }
 0x149   : > { %1981 = vmatprep.mubr.f32.mxu0 %v2669_v39  ;;  %1993 = vmatprep.mubr.f32.mxu1 %v432_v29 }
 0x14c   : > { %1982 = vmatmul.mubr.f32.gmra.mxu0 %v2681_v53  ;;  %1994 = vmatmul.mubr.f32.gmra.mxu1 %v434_v60 }
 0x14d   : > { %1984 = vmatprep.mubr.f32.mxu0 %v2697_v3  ;;  %1996 = vmatprep.mubr.f32.mxu1 %v449_v2 }
 0x150   : > { %1985 = vmatmul.mubr.f32.gmra.mxu0 %v2709_v18  ;;  %1997 = vmatmul.mubr.f32.gmra.mxu1 %v451_v13 }
 0x183   : > { %v1623_v23 = vpop.f32.mrf.mxu0 }
 0x184   : > { %v1703_v38 = vpop.f32.mrf.mxu1 }
 0x185   : > { %v1624_v55 = vpop.f32.mrf.mxu0 }
 0x186   : > { %v1704_v4 = vpop.f32.mrf.mxu1  ;;  %v1625_v39 = vadd.f32 %v1624_v55, %v1623_v23 }
 0x187   : > { %v1705_v8 = vadd.f32 %v1704_v4, %v1703_v38  ;;  %v1626_v10 = vpop.f32.mrf.mxu0 }
 0x188   : > { %v1706_v11 = vpop.f32.mrf.mxu1 }
 0x189   : > { %v2855_v12 = vadd.f32 %v1705_v8, %v1625_v39  ;;  %v1627_v53 = vpop.f32.mrf.mxu0 }
 0x18a   : > { %v1707_v14 = vpop.f32.mrf.mxu1  ;;  %v1628_v16 = vadd.f32 %v1627_v53, %v1626_v10 }
 0x18b   : > { %v1708_v3 = vadd.f32 %v1707_v14, %v1706_v11 }
 0x18c   : > { %v1629_v17 = vpop.f32.mrf.mxu0  ;;  %v1709_v19 = vpop.f32.mrf.mxu1 }
 0x18d   : > { %v2857_v20 = vadd.f32 %v1708_v3, %v1628_v16 }
 0x18e   : > { %v1630_v18 = vpop.f32.mrf.mxu0  ;;  %v1710_v24 = vpop.f32.mrf.mxu1 }
 0x18f   : > { %v1631_v25 = vadd.f32 %v1630_v18, %v1629_v17  ;;  %v1711_v31 = vadd.f32 %v1710_v24, %v1709_v19 }
 0x190   : > { %v1632_v34 = vpop.f32.mrf.mxu0  ;;  %v1712_v36 = vpop.f32.mrf.mxu1 }
 0x191   : > { %v2859_v40 = vadd.f32 %v1711_v31, %v1631_v25 }
 0x192   : > { %v1633_v43 = vpop.f32.mrf.mxu0  ;;  %v1713_v44 = vpop.f32.mrf.mxu1 }
 0x193   : > { %v1634_v46 = vadd.f32 %v1633_v43, %v1632_v34  ;;  %v1714_v47 = vadd.f32 %v1713_v44, %v1712_v36 }
 0x194   : > { %v1635_v28 = vpop.f32.mrf.mxu0  ;;  %v1715_v30 = vpop.f32.mrf.mxu1 }
 0x195   : > { %v2861_v32 = vadd.f32 %v1714_v47, %v1634_v46 }
 0x196   : > { %v1636_v35 = vpop.f32.mrf.mxu0  ;;  %v1716_v37 = vpop.f32.mrf.mxu1 }
 0x197   : > { %v1637_v45 = vadd.f32 %v1636_v35, %v1635_v28  ;;  %v1717_v48 = vadd.f32 %v1716_v37, %v1715_v30 }
 0x198   : > { %v1638_v49 = vpop.f32.mrf.mxu0  ;;  %v1718_v52 = vpop.f32.mrf.mxu1 }
 0x199   : > { %v2863_v58 = vadd.f32 %v1717_v48, %v1637_v45 }
 0x19a   : > { %v1639_v5 = vpop.f32.mrf.mxu0  ;;  %v1719_v6 = vpop.f32.mrf.mxu1 }
 0x19b   : > { %v1640_v9 = vadd.f32 %v1639_v5, %v1638_v49  ;;  %v1720_v15 = vadd.f32 %v1719_v6, %v1718_v52 }
 0x19c   : > { %v1641_v26 = vpop.f32.mrf.mxu0  ;;  %v1721_v27 = vpop.f32.mrf.mxu1 }
 0x19d   : > { %v2865_v33 = vadd.f32 %v1720_v15, %v1640_v9 }
 0x19e   : > { %v1642_v41 = vpop.f32.mrf.mxu0  ;;  %v1722_v57 = vpop.f32.mrf.mxu1 }
 0x19f   : > { %3130 = vst [vmem:[#allocation25_spill] sm:$0xff] %v2865_v33  ;;  %v1643_v59 = vadd.f32 %v1642_v41, %v1641_v26  ;;  %v1723_v62 = vadd.f32 %v1722_v57, %v1721_v27 }
 0x1a0   : > { %v1644_v7 = vpop.f32.mrf.mxu0  ;;  %v1724_v21 = vpop.f32.mrf.mxu1 }
 0x1a1   : > { %v2867_v22 = vadd.f32 %v1723_v62, %v1643_v59 }
 0x1a2   : > { %v1645_v29 = vpop.f32.mrf.mxu0  ;;  %v1725_v42 = vpop.f32.mrf.mxu1 }
 0x1a3   : > { %3131 = vst [vmem:[#allocation26_spill] sm:$0xff] %v2867_v22  ;;  %v1646_v50 = vadd.f32 %v1645_v29, %v1644_v7  ;;  %v1726_v51 = vadd.f32 %v1725_v42, %v1724_v21 }
 0x1a4   : > { %v1647_v54 = vpop.f32.mrf.mxu0  ;;  %v1727_v60 = vpop.f32.mrf.mxu1 }
 0x1a5   : > { %v2869_v61 = vadd.f32 %v1726_v51, %v1646_v50 }
 0x1a6   : > { %v1648_v63 = vpop.f32.mrf.mxu0  ;;  %v1728_v0 = vpop.f32.mrf.mxu1 }
 0x1a7   : > { %3132 = vst [vmem:[#allocation27_spill] sm:$0xff] %v2869_v61  ;;  %v1649_v1 = vadd.f32 %v1648_v63, %v1647_v54  ;;  %v1729_v56 = vadd.f32 %v1728_v0, %v1727_v60 }
 0x1a8   : > { %v1650_v2 = vpop.f32.mrf.mxu0  ;;  %v1730_v13 = vpop.f32.mrf.mxu1 }
 0x1a9   : > { %v2871_v23 = vadd.f32 %v1729_v56, %v1649_v1 }
 0x1aa   : > { %v1651_v38 = vpop.f32.mrf.mxu0  ;;  %v1731_v55 = vpop.f32.mrf.mxu1 }
 0x1ab   : > { %v1652_v4 = vadd.f32 %v1651_v38, %v1650_v2  ;;  %v1732_v39 = vadd.f32 %v1731_v55, %v1730_v13 }
 0x1ac   : > { %v1653_v8 = vpop.f32.mrf.mxu0  ;;  %v1733_v10 = vpop.f32.mrf.mxu1 }
 0x1ad   : > { %v2873_v11 = vadd.f32 %v1732_v39, %v1652_v4 }
 0x1ae   : > { %v1654_v53 = vpop.f32.mrf.mxu0  ;;  %v1734_v14 = vpop.f32.mrf.mxu1 }
 0x1af   : > { %v1655_v16 = vadd.f32 %v1654_v53, %v1653_v8  ;;  %v1735_v3 = vadd.f32 %v1734_v14, %v1733_v10 }
 0x1b0   : > { %v1656_v17 = vpop.f32.mrf.mxu0  ;;  %v1736_v19 = vpop.f32.mrf.mxu1 }
 0x1b1   : > { %v2875_v18 = vadd.f32 %v1735_v3, %v1655_v16 }
 0x1b2   : > { %v1657_v24 = vpop.f32.mrf.mxu0  ;;  %v1737_v25 = vpop.f32.mrf.mxu1 }
 0x1b3   : > { %3133 = vst [vmem:[#allocation28_spill] sm:$0xff] %v2875_v18  ;;  %v1658_v31 = vadd.f32 %v1657_v24, %v1656_v17  ;;  %v1738_v34 = vadd.f32 %v1737_v25, %v1736_v19 }
 0x1b4   : > { %v1659_v36 = vpop.f32.mrf.mxu0  ;;  %v1739_v43 = vpop.f32.mrf.mxu1 }
 0x1b5   : > { %v2877_v44 = vadd.f32 %v1738_v34, %v1658_v31 }
 0x1b6   : > { %v1660_v46 = vpop.f32.mrf.mxu0  ;;  %v1740_v47 = vpop.f32.mrf.mxu1 }
 0x1b7   : > { %3134 = vst [vmem:[#allocation29_spill] sm:$0xff] %v2877_v44  ;;  %v1661_v28 = vadd.f32 %v1660_v46, %v1659_v36  ;;  %v1741_v30 = vadd.f32 %v1740_v47, %v1739_v43 }
 0x1b8   : > { %v1662_v35 = vpop.f32.mrf.mxu0  ;;  %v1742_v37 = vpop.f32.mrf.mxu1 }
 0x1b9   : > { %v2879_v45 = vadd.f32 %v1741_v30, %v1661_v28 }
 0x1ba   : > { %v1663_v48 = vpop.f32.mrf.mxu0  ;;  %v1743_v49 = vpop.f32.mrf.mxu1 }
 0x1bb   : > { %3135 = vst [vmem:[#allocation30_spill] sm:$0xff] %v2879_v45  ;;  %v1664_v52 = vadd.f32 %v1663_v48, %v1662_v35  ;;  %v1744_v5 = vadd.f32 %v1743_v49, %v1742_v37 }
 0x1bc   : > { %v1665_v6 = vpop.f32.mrf.mxu0  ;;  %v1745_v9 = vpop.f32.mrf.mxu1 }
 0x1bd   : > { %v2881_v15 = vadd.f32 %v1744_v5, %v1664_v52 }
 0x1be   : > { %v1666_v26 = vpop.f32.mrf.mxu0  ;;  %v1746_v27 = vpop.f32.mrf.mxu1 }
 0x1bf   : > { %3136 = vst [vmem:[#allocation31_spill] sm:$0xff] %v2881_v15  ;;  %v1667_v41 = vadd.f32 %v1666_v26, %v1665_v6  ;;  %v1747_v57 = vadd.f32 %v1746_v27, %v1745_v9 }
 0x1c0   : > { %v1668_v59 = vpop.f32.mrf.mxu0  ;;  %v1748_v62 = vpop.f32.mrf.mxu1 }
 0x1c1   : > { %v2883_v7 = vadd.f32 %v1747_v57, %v1667_v41 }
 0x1c2   : > { %v1669_v21 = vpop.f32.mrf.mxu0  ;;  %v1749_v29 = vpop.f32.mrf.mxu1 }
 0x1c3   : > { %3137 = vst [vmem:[#allocation32_spill] sm:$0xff] %v2883_v7  ;;  %v1670_v42 = vadd.f32 %v1669_v21, %v1668_v59  ;;  %v1750_v50 = vadd.f32 %v1749_v29, %v1748_v62 }
 0x1c4   : > { %v1783_v51 = vpop.f32.mrf.mxu0  ;;  %v1863_v54 = vpop.f32.mrf.mxu1 }
 0x1c5   : > { %v2885_v60 = vadd.f32 %v1750_v50, %v1670_v42 }
 0x1c6   : > { %v1784_v63 = vpop.f32.mrf.mxu0  ;;  %v1864_v0 = vpop.f32.mrf.mxu1 }
 0x1c7   : > { %3138 = vst [vmem:[#allocation33_spill] sm:$0xff] %v2885_v60  ;;  %v1865_v44 = vadd.f32 %v1864_v0, %v1863_v54 }
 0x1c8   : > { %v1786_v1 = vpop.f32.mrf.mxu0  ;;  %v1866_v56 = vpop.f32.mrf.mxu1 }
 0x1ca   : > { %v1787_v2 = vpop.f32.mrf.mxu0  ;;  %v1867_v13 = vpop.f32.mrf.mxu1 }
 0x1cc   : > { %v1789_v38 = vpop.f32.mrf.mxu0  ;;  %v1869_v55 = vpop.f32.mrf.mxu1 }
 0x1ce   : > { %v1790_v4 = vpop.f32.mrf.mxu0  ;;  %v1870_v39 = vpop.f32.mrf.mxu1 }
 0x1d0   : > { %v1792_v8 = vpop.f32.mrf.mxu0  ;;  %v1872_v10 = vpop.f32.mrf.mxu1 }
 0x1d2   : > { %v1793_v53 = vpop.f32.mrf.mxu0  ;;  %v1873_v14 = vpop.f32.mrf.mxu1 }
 0x1d4   : > { %v1795_v16 = vpop.f32.mrf.mxu0  ;;  %v1875_v3 = vpop.f32.mrf.mxu1 }
 0x1d6   : > { %v1796_v17 = vpop.f32.mrf.mxu0  ;;  %v1876_v19 = vpop.f32.mrf.mxu1 }
 0x1d7   : > { %v1797_v18 = vadd.f32 %v1796_v17, %v1795_v16 }
 0x1d8   : > { %v2887_v24 = vpop.f32.mrf.mxu0  ;;  %v2889_v25 = vpop.f32.mrf.mxu1 }
 0x1d9   : > { %3139 = vst [vmem:[#allocation34_spill] sm:$0xff] %v2889_v25 }
 0x1da   : > { %v1799_v31 = vpop.f32.mrf.mxu0  ;;  %v2891_v34 = vpop.f32.mrf.mxu1 }
 0x1db   : > { %3140 = vst [vmem:[#allocation35_spill] sm:$0xff] %v2891_v34  ;;  %v1868_v34 = vadd.f32 %v1867_v13, %v1866_v56 }
 0x1dc   : > { %v2893_v36 = vpop.f32.mrf.mxu0  ;;  %v2895_v43 = vpop.f32.mrf.mxu1 }
 0x1dd   : > { %3141 = vst [vmem:[#allocation36_spill] sm:$0xff] %v2893_v36  ;;  %3142 = vst [vmem:[#allocation37_spill] sm:$0xff] %v2895_v43  ;;  %v1794_v43 = vadd.f32 %v1793_v53, %v1792_v8  ;;  %v975_v53 = vadd.f32 %v1797_v18, %v2863_v58 }
 0x1de   : > { %v2897_v46 = vpop.f32.mrf.mxu0  ;;  %v2899_v47 = vpop.f32.mrf.mxu1 }
 0x1df   : > { %3143 = vst [vmem:[#allocation38_spill] sm:$0xff] %v2897_v46  ;;  %3144 = vst [vmem:[#allocation39_spill] sm:$0xff] %v2899_v47  ;;  %v1791_v47 = vadd.f32 %v1790_v4, %v1789_v38 }
 0x1e0   : > { %v2901_v28 = vpop.f32.mrf.mxu0  ;;  %v2903_v30 = vpop.f32.mrf.mxu1 }
 0x1e1   : > { %3145 = vst [vmem:[#allocation40_spill] sm:$0xff] %v2901_v28  ;;  %3146 = vst [vmem:[#allocation41_spill] sm:$0xff] %v2903_v30  ;;  %v1788_v30 = vadd.f32 %v1787_v2, %v1786_v1  ;;  %v970_v1 = vadd.f32 %v1794_v43, %v2861_v32  ;;  %v1874_v2 = vadd.f32 %v1873_v14, %v1872_v10 }
 0x1e2   : > { %v2905_v35 = vpop.f32.mrf.mxu0  ;;  %v2907_v37 = vpop.f32.mrf.mxu1  ;;  %v3152_v10 = vld [vmem:[#allocation35_spill] sm:$0xff] }
 0x1e3   : > { %3147 = vst [vmem:[#allocation42_spill] sm:$0xff] %v2905_v35  ;;  %3148 = vst [vmem:[#allocation43_spill] sm:$0xff] %v2907_v37  ;;  %v1785_v37 = vadd.f32 %v1784_v63, %v1783_v51  ;;  %v965_v51 = vadd.f32 %v1791_v47, %v2859_v40  ;;  %v1871_v63 = vadd.f32 %v1870_v39, %v1869_v55  ;;  %v3151_v39 = vld [vmem:[#allocation34_spill] sm:$0xff] }
 0x1e4   : > { %v1807_v48 = vpop.f32.mrf.mxu0  ;;  %v1887_v49 = vpop.f32.mrf.mxu1  ;;  %v1800_v40 = vadd.f32 %v1799_v31, %v2887_v24  ;;  %v1880_v14 = vadd.f32 %v3152_v10, %v3151_v39  ;;  %v1115_v43 = vadd.f32 %v1874_v2, %v970_v1  ;;  %v3156_v24 = vld [vmem:[#allocation29_spill] sm:$0xff] }
 0x1e5   : > { %v1110_v47 = vadd.f32 %v1871_v63, %v965_v51 }
 0x1e6   : > { %v1808_v52 = vpop.f32.mrf.mxu0  ;;  %v1888_v5 = vpop.f32.mrf.mxu1 }
 0x1e7   : > { %v1809_v25 = vadd.f32 %v1808_v52, %v1807_v48  ;;  %v1889_v32 = vadd.f32 %v1888_v5, %v1887_v49 }
 0x1e8   : > { %v1810_v6 = vpop.f32.mrf.mxu0  ;;  %v1890_v9 = vpop.f32.mrf.mxu1  ;;  %v3153_v58 = vld [vmem:[#allocation40_spill] sm:$0xff] }
 0x1e9   : > { %v995_v13 = vadd.f32 %v1809_v25, %v2871_v23 }
 0x1ea   : > { %v1811_v26 = vpop.f32.mrf.mxu0  ;;  %v1891_v27 = vpop.f32.mrf.mxu1  ;;  %v3154_v18 = vld [vmem:[#allocation42_spill] sm:$0xff] }
 0x1eb   : > { %v1812_v33 = vadd.f32 %v1811_v26, %v1810_v6  ;;  %v1892_v0 = vadd.f32 %v1891_v27, %v1890_v9  ;;  %v1140_v6 = vadd.f32 %v1889_v32, %v995_v13  ;;  %v3158_v9 = vld [vmem:[#allocation36_spill] sm:$0xff]  ;;  %v3159_v26 = vld [vmem:[#allocation38_spill] sm:$0xff] }
 0x1ec   : > { %v1813_v41 = vpop.f32.mrf.mxu0  ;;  %v1893_v57 = vpop.f32.mrf.mxu1  ;;  %v1803_v27 = vadd.f32 %v3159_v26, %v3158_v9 }
 0x1ed   : > { %v1000_v54 = vadd.f32 %v1812_v33, %v2873_v11 }
 0x1ee   : > { %v1814_v59 = vpop.f32.mrf.mxu0  ;;  %v1894_v62 = vpop.f32.mrf.mxu1 }
 0x1ef   : > { %v1815_v8 = vadd.f32 %v1814_v59, %v1813_v41  ;;  %v1145_v48 = vadd.f32 %v1892_v0, %v1000_v54  ;;  %v3160_v41 = vld [vmem:[#allocation37_spill] sm:$0xff]  ;;  %v3165_v54 = vld [vmem:[#allocation31_spill] sm:$0xff] }
 0x1f0   : > { %v1816_v21 = vpop.f32.mrf.mxu0  ;;  %v1896_v29 = vpop.f32.mrf.mxu1 }
 0x1f2   : > { %v1817_v42 = vpop.f32.mrf.mxu0  ;;  %v1897_v50 = vpop.f32.mrf.mxu1 }
 0x1f3   : > { %v1818_v16 = vadd.f32 %v1817_v42, %v1816_v21  ;;  %v1898_v23 = vadd.f32 %v1897_v50, %v1896_v29  ;;  %v3164_v50 = vld [vmem:[#allocation27_spill] sm:$0xff] }
 0x1f4   : > { %v1819_v7 = vpop.f32.mrf.mxu0  ;;  %v2909_v60 = vpop.f32.mrf.mxu1 }
 0x1f5   : > { %3149 = vst [vmem:[#allocation44_spill] sm:$0xff] %v2909_v60  ;;  %v955_v60 = vadd.f32 %v1785_v37, %v2855_v12  ;;  %v1877_v12 = vadd.f32 %v1876_v19, %v1875_v3  ;;  %v1806_v3 = vadd.f32 %v3154_v18, %v3153_v58  ;;  %v3155_v19 = vld [vmem:[#allocation28_spill] sm:$0xff]  ;;  %v1895_v37 = vadd.f32 %v1894_v62, %v1893_v57  ;;  %v3161_v57 = vld [vmem:[#allocation39_spill] sm:$0xff]  ;;  %v3162_v62 = vld [vmem:[#allocation41_spill] sm:$0xff] }
 0x1f6   : > { %v1820_v22 = vpop.f32.mrf.mxu0  ;;  %v2911_v45 = vpop.f32.mrf.mxu1  ;;  %v1010_v31 = vadd.f32 %v1818_v16, %v3156_v24  ;;  %v2946_v59 = vadd.f32 %v3161_v57, %v3160_v41 }
 0x1f7   : > { %3150 = vst [vmem:[#allocation45_spill] sm:$0xff] %v2911_v45  ;;  %v960_v45 = vadd.f32 %v1788_v30, %v2857_v20  ;;  %v1100_v55 = vadd.f32 %v1865_v44, %v955_v60  ;;  %v1005_v30 = vadd.f32 %v1815_v8, %v3155_v19  ;;  %v2937_v49 = vadd.f32 %v1877_v12, %v975_v53 }
 0x1f8   : > { %v1822_v15 = vpop.f32.mrf.mxu0  ;;  %v2913_v61 = vpop.f32.mrf.mxu1  ;;  %v1821_v21 = vadd.f32 %v1820_v22, %v1819_v7  ;;  %v990_v51 = vadd.f32 %v1806_v3, %v3164_v50  ;;  %v1155_v22 = vadd.f32 %v1898_v23, %v1010_v31 }
 0x1f9   : > { %v1105_v11 = vadd.f32 %v1868_v34, %v960_v45  ;;  %v3157_v45 = vld [vmem:[#allocation25_spill] sm:$0xff]  ;;  %v1150_v2 = vadd.f32 %v1895_v37, %v1005_v30  ;;  %v3169_v30 = vld [vmem:[#allocation26_spill] sm:$0xff] }
 0x1fa   : > { %v1823_v46 = vpop.f32.mrf.mxu0  ;;  %v1903_v36 = vpop.f32.mrf.mxu1  ;;  %v980_v34 = vadd.f32 %v1800_v40, %v3157_v45  ;;  %v985_v37 = vadd.f32 %v1803_v27, %v3169_v30 }
 0x1fb   : > { %v1824_v44 = vadd.f32 %v1823_v46, %v1822_v15  ;;  %v3163_v15 = vld [vmem:[#allocation43_spill] sm:$0xff]  ;;  %v1904_v8 = vadd.f32 %v1903_v36, %v2913_v61 }
 0x1fc   : > { %v2915_v35 = vpop.f32.mrf.mxu0  ;;  %v2917_v28 = vpop.f32.mrf.mxu1  ;;  %v1886_v46 = vadd.f32 %v3163_v15, %v3162_v62  ;;  %v3167_v10 = vld [vmem:[#allocation44_spill] sm:$0xff]  ;;  %v1130_v15 = vadd.f32 %v2946_v59, %v985_v37 }
 0x1fd   : > { %v1020_v0 = vadd.f32 %v1824_v44, %v3165_v54 }
 0x1fe   : > { %v1826_v38 = vpop.f32.mrf.mxu0  ;;  %v2923_v4 = vpop.f32.mrf.mxu1 }
 0x1ff   : > { %v1827_v36 = vadd.f32 %v1826_v38, %v2915_v35  ;;  %v1165_v31 = vadd.f32 %v1904_v8, %v1020_v0 }
 0x200   : > { %v1828_v20 = vpop.f32.mrf.mxu0  ;;  %v2927_v56 = vpop.f32.mrf.mxu1 }
 0x202   : > { %v1829_v17 = vpop.f32.mrf.mxu0  ;;  %v1909_v33 = vpop.f32.mrf.mxu1 }
 0x203   : > { %v1830_v53 = vadd.f32 %v1829_v17, %v1828_v20  ;;  %v1910_v35 = vadd.f32 %v1909_v33, %v2927_v56 }
 0x204   : > { %v1977_v60 = vpop.f32.mrf.mxu0  ;;  %v1989_v25 = vpop.f32.mrf.mxu1 }
 0x205   : > { %v1250_v52 = vadd.f32 %v1977_v60, %v1105_v11  ;;  %v2940_v5 = vadd.f32 %v1989_v25, %v1145_v48  ;;  %v3168_v11 = vld [vmem:[#allocation45_spill] sm:$0xff]  ;;  %v3171_v25 = vld [vmem:[#allocation32_spill] sm:$0xff] }
 0x206   : > { %v1244_v29 = vpop.f32.mrf.mxu0  ;;  %v1284_v42 = vpop.f32.mrf.mxu1  ;;  %v1901_v61 = vadd.f32 %v3168_v11, %v3167_v10  ;;  %v3170_v48 = vld [vmem:[#allocation33_spill] sm:$0xff]  ;;  %v1025_v45 = vadd.f32 %v1827_v36, %v3171_v25 }
 0x207   : > { %1385 = vst [vmem:[%s2516_s4 + $0x8] sm:$0xff] %v1250_v52  ;;  %1393 = vst [vmem:[%s2516_s4 + $0x48] sm:$0xff] %v2940_v5  ;;  %v1245_v63 = vadd.f32 %v1244_v29, %v1100_v55  ;;  %v2954_v1 = vadd.f32 %v1284_v42, %v1140_v6  ;;  %v1345_v16 = vmul.f32 %v1250_v52, %v1250_v52  ;;  %v3166_v55 = vld [vmem:[#allocation30_spill] sm:$0xff] }
 0x208   : > { %v1980_v12 = vpop.f32.mrf.mxu0  ;;  %v1992_v7 = vpop.f32.mrf.mxu1  ;;  %v1015_v39 = vadd.f32 %v1821_v21, %v3166_v55  ;;  %v1030_v24 = vadd.f32 %v1830_v53, %v3170_v48 }
 0x209   : > { %v1323_v40 = vadd.f32 %v1250_v52, %v1245_v63  ;;  %v1344_v13 = vmul.f32 %v1245_v63, %v1245_v63  ;;  %1384 = vst [vmem:[%s2516_s4] sm:$0xff] %v1245_v63  ;;  %1392 = vst [vmem:[%s2516_s4 + $0x40] sm:$0xff] %v2954_v1  ;;  %v1260_v32 = vadd.f32 %v1980_v12, %v1115_v43 }
 0x20a   : > { %v2965_v20 = vadd.f32 %v1992_v7, %v1155_v22  ;;  %v1254_v17 = vpop.f32.mrf.mxu0  ;;  %v1294_v58 = vpop.f32.mrf.mxu1  ;;  %v1125_v43 = vadd.f32 %v1880_v14, %v980_v34  ;;  %v1907_v34 = vadd.f32 %v2923_v4, %v2917_v28  ;;  %v1160_v52 = vadd.f32 %v1901_v61, %v1015_v39 }
 0x20b   : > { %v1360_v18 = vadd.f32 %v1345_v16, %v1344_v13  ;;  %1387 = vst [vmem:[%s2516_s4 + $0x18] sm:$0xff] %v1260_v32  ;;  %v1255_v3 = vadd.f32 %v1254_v17, %v1110_v47  ;;  %v2968_v19 = vadd.f32 %v1294_v58, %v1150_v2  ;;  %v1135_v47 = vadd.f32 %v1886_v46, %v990_v51 }
 0x20c   : > { %1395 = vst [vmem:[%s2516_s4 + $0x58] sm:$0xff] %v2965_v20  ;;  %v1983_v38 = vpop.f32.mrf.mxu0  ;;  %v1995_v23 = vpop.f32.mrf.mxu1  ;;  %v1347_v9 = vmul.f32 %v1260_v32, %v1260_v32  ;;  %v1175_v57 = vadd.f32 %v1910_v35, %v1030_v24  ;;  %v1170_v51 = vadd.f32 %v1907_v34, %v1025_v45 }
 0x20d   : > { %v1324_v44 = vadd.f32 %v1323_v40, %v1255_v3  ;;  %v1346_v60 = vmul.f32 %v1255_v3, %v1255_v3  ;;  %1386 = vst [vmem:[%s2516_s4 + $0x10] sm:$0xff] %v1255_v3  ;;  %1394 = vst [vmem:[%s2516_s4 + $0x50] sm:$0xff] %v2968_v19  ;;  %v1270_v14 = vadd.f32 %v1983_v38, %v1125_v43 }
 0x20e   : > { %v2983_v56 = vadd.f32 %v1995_v23, %v1165_v31  ;;  %v1264_v33 = vpop.f32.mrf.mxu0  ;;  %v1304_v6 = vpop.f32.mrf.mxu1 }
 0x20f   : > { %v1361_v26 = vadd.f32 %v1360_v18, %v1346_v60  ;;  %1389 = vst [vmem:[%s2516_s4 + $0x28] sm:$0xff] %v1270_v14  ;;  %v1265_v27 = vadd.f32 %v1264_v33, %v2937_v49  ;;  %v1325_v41 = vadd.f32 %v1324_v44, %v1260_v32  ;;  %v2991_v28 = vadd.f32 %v1304_v6, %v1160_v52 }
 0x210   : > { %1397 = vst [vmem:[%s2516_s4 + $0x68] sm:$0xff] %v2983_v56  ;;  %v1986_v4 = vpop.f32.mrf.mxu0  ;;  %v1998_v62 = vpop.f32.mrf.mxu1  ;;  %v1349_v2 = vmul.f32 %v1270_v14, %v1270_v14 }
 0x211   : > { %v1326_v46 = vadd.f32 %v1325_v41, %v1265_v27  ;;  %v1348_v21 = vmul.f32 %v1265_v27, %v1265_v27  ;;  %v1362_v29 = vadd.f32 %v1361_v26, %v1347_v9  ;;  %1388 = vst [vmem:[%s2516_s4 + $0x20] sm:$0xff] %v1265_v27  ;;  %v1280_v42 = vadd.f32 %v1986_v4, %v1135_v47 }
 0x212   : > { %1396 = vst [vmem:[%s2516_s4 + $0x60] sm:$0xff] %v2991_v28  ;;  %v2999_v49 = vadd.f32 %v1998_v62, %v1175_v57  ;;  %v1274_v50 = vpop.f32.mrf.mxu0  ;;  %v1314_v63 = vpop.f32.mrf.mxu1 }
 0x213   : > { %v1363_v54 = vadd.f32 %v1362_v29, %v1348_v21  ;;  %1391 = vst [vmem:[%s2516_s4 + $0x38] sm:$0xff] %v1280_v42  ;;  %v1275_v59 = vadd.f32 %v1274_v50, %v1130_v15  ;;  %v1327_v0 = vadd.f32 %v1326_v46, %v1270_v14  ;;  %v1315_v8 = vadd.f32 %v1314_v63, %v1170_v51 }
 0x214   : > { %1399 = vst [vmem:[%s2516_s4 + $0x78] sm:$0xff] %v2999_v49  ;;  %v1351_v7 = vmul.f32 %v1280_v42, %v1280_v42 }
 0x215   : > { %v1328_v53 = vadd.f32 %v1327_v0, %v1275_v59  ;;  %v1350_v12 = vmul.f32 %v1275_v59, %v1275_v59  ;;  %v1364_v22 = vadd.f32 %v1363_v54, %v1349_v2  ;;  %1390 = vst [vmem:[%s2516_s4 + $0x30] sm:$0xff] %v1275_v59  ;;  %1398 = vst [vmem:[%s2516_s4 + $0x70] sm:$0xff] %v1315_v8 }
 0x217   : > { %v1329_v16 = vadd.f32 %v1328_v53, %v1280_v42  ;;  %v1365_v40 = vadd.f32 %v1364_v22, %v1350_v12 }
 0x218   : > { %2242 = shalt.err (!%p2239_p2)
}
 0x219   : > { %s2243_s4 = scalar_lea.hbm %s3009_s11, 2048  ;;  %s2247_s23 = scalar_lea.hbm %s3113_s2, 8192 }
 0x21a   : > { %p2244_p4 = scmp.ne.s32.totalorder %s3009_s11, %s2243_s4  ;;  %p2248_p7 = scmp.lt.s32.totalorder %s3009_s11, %s3113_s2 }
 0x21b   : > { %p2249_p9 = scmp.lt.s32.totalorder %s2247_s23, %s2243_s4 }
 0x21c   : > { %p2245_p5 = pnand %p2244_p4, %p2460_p3 }
 0x21d   : > { %p2250_p11 = por %p2249_p9, %p2248_p7 }
 0x21e   : > { %p2246_p6 = pneg %p2245_p5 }
 0x220   : > { %p2251_p10 = pnand %p2250_p11, %p2246_p6 }
 0x222   : > { %2254 = shalt.err (!%p2251_p10)
}
 0x223   : > { %s2385_s9 = smov 128   ;;  %s2386_s29 = smov 8   ;;  %v1352_v13 = vmul.f32 %v2954_v1, %v2954_v1  ;;  %v1330_v32 = vadd.f32 %v1329_v16, %v2954_v1  ;;  %v1366_v55 = vadd.f32 %v1365_v40, %v1351_v7  ;;  %v1353_v39 = vmul.f32 %v2940_v5, %v2940_v5 }
 0x224   : > { %2035 = dma.vmem_to_hbm [thread:$0]  (%p2460_p3), %s3002_s20, 2048, %s3009_s11, %s1401_s10, %s2385_s9, %s2385_s9, %s2386_s29   ;;  %v1354_v61 = vmul.f32 %v2968_v19, %v2968_v19  ;;  %v1355_v58 = vmul.f32 %v2965_v20, %v2965_v20  ;;  %v1356_v1 = vmul.f32 %v2991_v28, %v2991_v28  ;;  %v1358_v24 = vmul.f32 %v1315_v8, %v1315_v8 }
 0x225   : > { %v1331_v10 = vadd.f32 %v1330_v32, %v2940_v5  ;;  %v1367_v11 = vadd.f32 %v1366_v55, %v1352_v13  ;;  %v1357_v5 = vmul.f32 %v2983_v56, %v2983_v56  ;;  %s1585_s20 = sshll.u32 %s2349_s16, 1  ;;  %s1440_s11 = sshll.u32 %s2518_s6, 4  ;;  %vm1381_vm2 = vcmask 1040384   ;;  %s1441_s11 = int_to_ptr.vmem [resolvable:$true] %s1440_s11 }
 0x226   : > { %s1436_s7 = sadd.s32 %s2345_s15, %s1585_s20  ;;  %s1406_s16 = scalar_lea.sflag [#allocation8], %s2509_s24 }
 0x227   : > { %v1368_v36 = vadd.f32 %v1367_v11, %v1353_v39  ;;  %v1332_v17 = vadd.f32 %v1331_v10, %v2968_v19  ;;  %s1586_s8 = sshll.u32 %s1436_s7, 5  ;;  %s2255_s18 = scalar_lea.vmem %s1441_s11, 32 }
 0x228   : > { %s3063_s17 = scalar_lea.hbm %s3114_s3, %s1586_s8  ;;  %p2256_p12 = scmp.ne.s32.totalorder %s1441_s11, %s2255_s18 }
 0x229   : > { %v1333_v18 = vadd.f32 %v1332_v17, %v2965_v20  ;;  %v1369_v3 = vadd.f32 %v1368_v36, %v1354_v61  ;;  %v1359_v20 = vmul.f32 %v2999_v49, %v2999_v49  ;;  %s2387_s15 = smov [#allocation7]  }
 0x22a   : > { %p2257_p13 = pnand %p2256_p12, %p2460_p3  ;;  %s2259_s22 = sshll.u32 %s2387_s15, 4  ;;  %s2260_s22 = int_to_ptr.vmem [resolvable:$false] %s2259_s22 }
 0x22b   : > { %v1334_v43 = vadd.f32 %v1333_v18, %v2991_v28  ;;  %v1370_v30 = vadd.f32 %v1369_v3, %v1355_v58  ;;  %s2261_s4 = scalar_lea.vmem %s2260_s22, 64  ;;  %p2262_p1 = scmp.lt.s32.totalorder %s1441_s11, %s2260_s22 }
 0x22c   : > { %p2258_p0 = pneg %p2257_p13  ;;  %p2263_p2 = scmp.lt.s32.totalorder %s2261_s4, %s2255_s18 }
 0x22d   : > { %v1335_v37 = vadd.f32 %v1334_v43, %v2983_v56  ;;  %v1371_v48 = vadd.f32 %v1370_v30, %v1356_v1 }
 0x22e   : > { %p2264_p4 = por %p2263_p2, %p2262_p1 }
 0x22f   : > { %v1336_v19 = vadd.f32 %v1335_v37, %v1315_v8  ;;  %v1372_v35 = vadd.f32 %v1371_v48, %v1357_v5 }
 0x230   : > { %p2265_p5 = pnand %p2264_p4, %p2258_p0 }
 0x231   : > { %v1337_v38 = vadd.f32 %v1336_v19, %v2999_v49  ;;  %v1373_v31 = vadd.f32 %v1372_v35, %v1358_v24 }
 0x233   : > { %v1338_v23 = vrot.slane %v1337_v38, 4  ;;  %v1374_v44 = vadd.f32 %v1373_v31, %v1359_v20 }
 0x235   : > { %v1339_v60 = vadd.f32 %v1338_v23, %v1337_v38  ;;  %v1375_v14 = vrot.slane %v1374_v44, 4 }
 0x237   : > { %v1340_v47 = vrot.slane %v1339_v60, 2  ;;  %v1376_v25 = vadd.f32 %v1375_v14, %v1374_v44 }
 0x239   : > { %v1341_v45 = vadd.f32 %v1340_v47, %v1339_v60  ;;  %v1377_v34 = vrot.slane %v1376_v25, 2 }
 0x23b   : > { %v1342_v56 = vrot.slane %v1341_v45, 1  ;;  %v1378_v33 = vadd.f32 %v1377_v34, %v1376_v25 }
 0x23d   : > { %v1379_v52 = vrot.slane %v1378_v33, 1  ;;  %v1343_v6 = vadd.f32 %v1342_v56, %v1341_v45 }
 0x23f   : > { %v1380_v9 = vadd.f32 %v1379_v52, %v1378_v33 }
 0x241   : > { %v1382_v26 = vsel %vm1381_vm2, %v1343_v6, %v1380_v9 }
 0x242   : > { %1383 = vst [vmem:[%s2518_s6] sm:$0x3] %v1382_v26 }
 0x243   : > { %2268 = shalt.err (!%p2265_p5)
}
 0x244   : > { %s2269_s6 = scalar_lea.hbm %s3063_s17, 32  ;;  %s2273_s28 = scalar_lea.hbm %s3114_s3, 128 }
 0x245   : > { %p2270_p6 = scmp.ne.s32.totalorder %s3063_s17, %s2269_s6  ;;  %p2274_p11 = scmp.lt.s32.totalorder %s3063_s17, %s3114_s3 }
 0x246   : > { %p2275_p10 = scmp.lt.s32.totalorder %s2273_s28, %s2269_s6 }
 0x247   : > { %p2271_p7 = pnand %p2270_p6, %p2460_p3 }
 0x248   : > { %p2276_p12 = por %p2275_p10, %p2274_p11 }
 0x249   : > { %p2272_p9 = pneg %p2271_p7 }
 0x24b   : > { %p2277_p13 = pnand %p2276_p12, %p2272_p9 }
 0x24d   : > { %2280 = shalt.err (!%p2277_p13)
}
 0x24e   : > { %2036 = dma.vmem_to_hbm [thread:$0]  (%p2460_p3), %s1441_s11, 32, %s3063_s17, %s1406_s16  }
 0x24f PF: > { %p2052_p0 = scmp.ge.s32.totalorder %s2361_s19, 2  ;;  %s1452_s21 = sand.u32 1, %s2333_s12  }
 0x250   : > { %s1453_s9 = scalar_lea.sflag [#allocation5], %s1452_s21 }
 0x251   : > { %p2044_p1 = pnand %p2052_p0, %p2469_p8 }
 0x253   : > { %p2045_p2 = pneg %p2044_p1 }
 0x255   : > { %2324 = dma.done.wait (%p2045_p2), %s1453_s9, 2048  }
 0x256   : > { %2326 = vsyncadd (%p2045_p2), %s1453_s9, 4294965248  ;;  %s1462_s29 = scalar_lea.sflag [#allocation8], %s1452_s21 }
 0x257   : > { %2328 = dma.done.wait (%p2045_p2), %s1462_s29, 32  }
 0x258   : > { %2330 = vsyncadd (%p2045_p2), %s1462_s29, 4294967264  ;;  %s21_s19 = sadd.s32 1, %s2361_s19   ;;  %s3172_s15 = sld [smem:[#allocation21_spill]] }
 0x259   : > { %p18_p4 = scmp.ge.s32.totalorder %s21_s19, 6   ;;  %s3173_s16 = sld [smem:[#allocation22_spill]] }
 0x25a   : > { %s3174_s17 = sld [smem:[#allocation23_spill]]  ;;  %s3176_s12 = smov %s2337_s13 }
 0x25b   : > { %s3175_s18 = sld [smem:[#allocation24_spill]]  ;;  %s3177_s13 = smov %s2341_s14 }
 0x25c   : > { %s3178_s14 = smov %s2487_s5  ;;  %20 = sbr.rel (!%p18_p4) target bundleno = 10 (0xa), region = 100 }
 0x261   :  { %1467 = vsyncpa [#allocation4], 1 }
 0x262   :  { %1469 = vsyncpa [#allocation4 + $0x1], 1 }
 0x263   :  { %1470 = vsyncpa [#allocation5], 1 }
 0x264   :  { %1472 = vsyncpa [#allocation5 + $0x1], 1 }
 0x265   :  { %1473 = vsyncpa [#allocation8], 1 }
 0x266   :  { %1475 = vsyncpa [#allocation8 + $0x1], 1 }

</bundles_post_ra>
